<compile_context>
chip_gen: v7x
topology: tpu7x:2x2x1
jax: 0.10.0
libtpu: 0.0.40
codegen_flags: <defaults>
</compile_context>

<pallas_src>
import functools

import jax
import jax.numpy as jnp
import numpy as np
from jax.experimental import pallas as pl
from jax.experimental.pallas import tpu as pltpu


# ----------------------------- Pallas kernel --------------------------------
def encoder_kernel(emb_ref,                     # (T, BB, E)  bf16 time-major embedded block
                   wih_ref,                     # (E, 8H)     bf16 interleaved fwd/bwd input weights
                   whh_ref,                     # (2H, 8H)    bf16 block-structured recurrent weights
                   b_ref,                       # (1, 8H)     f32 folded biases (b_ih + b_hh)
                   wml_ref,                     # (2H, 2L)    bf16 [w_mean.T | w_logvar.T]
                   bml_ref,                     # (1, 2L)     f32 [b_mean | b_logvar]
                   eps_ref,                     # (BB, L)     f32 reparameterization noise
                   out_ref,                     # (BB, 3L)    f32 packed [z | mean | logvar]
                   gx_scr,                      # (T*BB, 8H)  f32 VMEM scratch (hoisted projection)
                   *, T, BB, E, H, L):
    H2, H4, H6, H8 = 2 * H, 4 * H, 6 * H, 8 * H

    # --- hoisted input projection: one MXU matmul for all steps & both dirs,
    #     written into scratch so it is not live across the recurrence.
    emb2 = emb_ref[...].reshape(T * BB, E)                      # leading-dim merge (free, BB%8==0)
    gx_scr[...] = (jnp.dot(emb2, wih_ref[...], preferred_element_type=jnp.float32)
                   + b_ref[...])                                # (T*BB, 8H) f32

    whh = whh_ref[...]                                          # bf16, VMEM-resident

    # Lane mask for fwd/bwd column pairs (each gate pair is [*_f | *_b], width H).
    col = jax.lax.broadcasted_iota(jnp.int32, (BB, H8), 1)
    fwd_cols = (col % H2) < H

    # Fused fwd/bwd recurrence: one (BB,2H)x(2H,8H) MXU dot per step.
    # The fwd/bwd select stays in-body (hoisting it would need a second
    # T*BB*8H scratch); it is off the dot->activation->h dependency chain.
    def step(t, carry):
        h, c = carry
        off_f = pl.multiple_of(t * BB, BB)
        off_b = pl.multiple_of((T - 1 - t) * BB, BB)
        gx_f = gx_scr[pl.ds(off_f, BB), :]                      # fwd consumes x_t
        gx_b = gx_scr[pl.ds(off_b, BB), :]                      # bwd consumes x_{T-1-t}
        gx_t = jnp.where(fwd_cols, gx_f, gx_b)                  # (BB, 8H)
        gates = (jnp.dot(h.astype(whh.dtype), whh,
                         preferred_element_type=jnp.float32) + gx_t)
        # Column layout [i_f,i_b, f_f,f_b, o_f,o_b, g_f,g_b]:
        # one sigmoid over the contiguous [0:6H] block, one tanh over [6H:8H].
        sig = jax.nn.sigmoid(gates[:, :H6])
        g_g = jnp.tanh(gates[:, H6:])
        i_g = sig[:, 0:H2]
        f_g = sig[:, H2:H4]
        o_g = sig[:, H4:H6]
        c_new = f_g * c + i_g * g_g
        h_new = o_g * jnp.tanh(c_new)
        return h_new, c_new

    h0 = jnp.zeros((BB, H2), jnp.float32)
    c0 = jnp.zeros((BB, H2), jnp.float32)
    h, _ = jax.lax.fori_loop(0, T, step, (h0, c0),
                             unroll=True if T <= 16 else 8)

    # h == torch.cat((hidden[-2], hidden[-1]), dim=1)  -> (BB, 2H), [h_fwd | h_bwd]

    # --- fused epilogue: one matmul for mean & logvar, single packed store ---
    ml = (jnp.dot(h.astype(wml_ref.dtype), wml_ref[...],
                  preferred_element_type=jnp.float32) + bml_ref[...])          # (BB, 2L)
    mean = ml[:, :L]
    logvar = ml[:, L:]
    z = mean + eps_ref[...] * jnp.exp(0.5 * logvar)
    out_ref[...] = jnp.concatenate([z, mean, logvar], axis=1)                  # (BB, 3L)


# ------------------------- wrapper-side weight packing ------------------------
# PyTorch gate order along rows of w_ih/w_hh is [i, f, g, o]; the kernel wants
# column order [i, f, o, g] with fwd/bwd interleaved per gate -> g is contiguous
# and last, so sigmoid/tanh each act on one contiguous slice.
_GATE_ORDER = (0, 1, 3, 2)   # i, f, o, g


def _interleave_gate_cols(wf, wb, H):
    """wf, wb: (in_dim, 4H) with PyTorch gate order [i,f,g,o] along columns.
    Returns (in_dim, 8H) with columns [i_f,i_b, f_f,f_b, o_f,o_b, g_f,g_b]."""
    cols = []
    for g in _GATE_ORDER:
        cols.append(wf[:, g * H:(g + 1) * H])
        cols.append(wb[:, g * H:(g + 1) * H])
    return jnp.concatenate(cols, axis=1)


def build_kernel_weights(params):
    H = params["w_hh_f"].shape[1]
    L = params["w_mean"].shape[0]
    mx = jnp.bfloat16   # MXU operand dtype; accumulation stays f32 in-kernel.

    # Input weights, both directions fused into one (E, 8H) operand.
    wih = _interleave_gate_cols(params["w_ih_f"].T, params["w_ih_b"].T, H).astype(mx)

    # Folded biases (b_ih + b_hh), interleaved the same way (kept f32).
    bf = (params["b_ih_f"] + params["b_hh_f"]).reshape(1, 4 * H)
    bb = (params["b_ih_b"] + params["b_hh_b"]).reshape(1, 4 * H)
    bias = _interleave_gate_cols(bf, bb, H).astype(jnp.float32)

    # Block-structured recurrent weights: rows 0:H (fwd h) feed *_f columns,
    # rows H:2H (bwd h) feed *_b columns; cross blocks are zero.
    # TODO(synk): at production H (>=128) benchmark two half-K dots vs this fused
    #             (2H,8H) operand (half the fused MACs multiply structural zeros).
    whhf_t = params["w_hh_f"].T                                                 # (H, 4H)
    whhb_t = params["w_hh_b"].T
    zH = jnp.zeros((H, 4 * H), whhf_t.dtype)
    whh = jnp.concatenate([_interleave_gate_cols(whhf_t, zH, H),
                           _interleave_gate_cols(zH, whhb_t, H)], axis=0).astype(mx)

    # Fused epilogue weights.
    wml = jnp.concatenate([params["w_mean"].T, params["w_logvar"].T], axis=1).astype(mx)
    bml = jnp.concatenate([params["b_mean"], params["b_logvar"]]
                          ).reshape(1, 2 * L).astype(jnp.float32)
    return wih, whh, bias, wml, bml


# ------------------------------- wrapper -------------------------------------
def _round_up(x, m):
    return ((x + m - 1) // m) * m


def _choose_block_b(B):
    """Batch block: multiple of 8, as large as reasonable (<=128), and when the
    batch allows it >=2 blocks so the parallel grid axis shards across TCs."""
    Bp = _round_up(B, 8)
    if Bp <= 8:
        return 8
    return min(128, _round_up(pl.cdiv(Bp, 2), 8))


def _vmem_limit_bytes(T, BB, E, H, L):
    emb = 2 * T * BB * E * 2                                     # bf16, double-buffered
    gx = T * BB * 8 * H * 4                                      # f32 scratch
    w = (E * 8 * H + 2 * H * 8 * H + 2 * H * 2 * L) * 2          # bf16, single-buffered
    w += (8 * H + 2 * L) * 4                                     # f32 biases
    io = 2 * (BB * L * 4 + BB * 3 * L * 4)
    need = emb + gx + w + io
    # generous headroom, clamped to v7x's 64 MiB physical VMEM
    return int(min(max(2 * need, 32 * 1024 * 1024), 64 * 1024 * 1024))


def encoder_forward(tokens, params, eps, *, block_b=None):
    """tokens: (B, T) int32; returns (z, mean, logvar) each (B, latent_dim)."""
    B, T = tokens.shape
    E = params["embedding"].shape[1]
    H = params["w_hh_f"].shape[1]
    L = params["w_mean"].shape[0]

    if block_b is None:
        block_b = _choose_block_b(B)
    assert block_b % 8 == 0, "batch block must be a multiple of 8"
    Bp = _round_up(B, block_b)
    nb = Bp // block_b

    # Pad the batch (token 0 == padding_idx; padded rows are discarded).
    tok_p = tokens if Bp == B else jnp.pad(tokens, ((0, Bp - B), (0, 0)))
    eps_p = eps if Bp == B else jnp.pad(eps, ((0, Bp - B), (0, 0)))

    # Embedding lookup (gather) stays in XLA glue; gather directly into the
    # kernel's time-major (T, B, E) layout (only the tiny (B,T) int token array
    # is transposed) and cast the only streamed operand to bf16.
    emb_tb = params["embedding"][tok_p.T].astype(jnp.bfloat16)                  # (T, Bp, E)

    wih, whh, bias, wml, bml = build_kernel_weights(params)

    kernel = functools.partial(encoder_kernel, T=T, BB=block_b, E=E, H=H, L=L)

    def w_spec(arr):
        # Constant-index, VMEM-resident weights: single-buffer them.
        nd = arr.ndim
        return pl.BlockSpec(arr.shape, lambda b, _nd=nd: (0,) * _nd,
                            pipeline_mode=pl.Buffered(1))

    out = pl.pallas_call(
        kernel,
        grid=(nb,),
        in_specs=[
            pl.BlockSpec((T, block_b, E), lambda b: (0, b, 0)),                  # emb (batch-blocked)
            w_spec(wih),
            w_spec(whh),
            w_spec(bias),
            w_spec(wml),
            w_spec(bml),
            pl.BlockSpec((block_b, L), lambda b: (b, 0)),                        # eps
        ],
        out_specs=pl.BlockSpec((block_b, 3 * L), lambda b: (b, 0)),
        out_shape=jax.ShapeDtypeStruct((Bp, 3 * L), jnp.float32),
        scratch_shapes=[pltpu.VMEM((T * block_b, 8 * H), jnp.float32)],
        compiler_params=pltpu.CompilerParams(
            dimension_semantics=("parallel",),
            vmem_limit_bytes=_vmem_limit_bytes(T, block_b, E, H, L),
        ),
    )(emb_tb, wih, whh, bias, wml, bml, eps_p)

    out = out[:B]
    z = out[:, 0 * L:1 * L]
    mean = out[:, 1 * L:2 * L]
    logvar = out[:, 2 * L:3 * L]
    return z, mean, logvar


# --------------------------- pure-JAX reference -------------------------------
def encoder_reference(tokens, params, eps):
    embedded = params["embedding"][tokens].astype(jnp.float32)   # (B, T, E)
    B, T, E = embedded.shape
    H = params["w_hh_f"].shape[1]

    def lstm_dir(w_ih, w_hh, b_ih, b_hh, reverse):
        def step(carry, x_t):
            h, c = carry
            gates = x_t @ w_ih.T + h @ w_hh.T + b_ih + b_hh
            i = jax.nn.sigmoid(gates[:, 0 * H:1 * H])
            f = jax.nn.sigmoid(gates[:, 1 * H:2 * H])
            g = jnp.tanh(gates[:, 2 * H:3 * H])
            o = jax.nn.sigmoid(gates[:, 3 * H:4 * H])
            c_new = f * c + i * g
            h_new = o * jnp.tanh(c_new)
            return (h_new, c_new), None

        xs = jnp.transpose(embedded, (1, 0, 2))
        if reverse:
            xs = xs[::-1]
        (h, _), _ = jax.lax.scan(step, (jnp.zeros((B, H)), jnp.zeros((B, H))), xs)
        return h

    h_f = lstm_dir(params["w_ih_f"], params["w_hh_f"], params["b_ih_f"], params["b_hh_f"], False)
    h_b = lstm_dir(params["w_ih_b"], params["w_hh_b"], params["b_ih_b"], params["b_hh_b"], True)
    hidden = jnp.concatenate([h_f, h_b], axis=1)
    mean = hidden @ params["w_mean"].T + params["b_mean"]
    logvar = hidden @ params["w_logvar"].T + params["b_logvar"]
    std = jnp.exp(0.5 * logvar)
    z = mean + eps * std
    return z, mean, logvar


# ------------------------------- parameters -----------------------------------
def init_params(key, vocab_size, embedding_dim, hidden_dim, latent_dim):
    keys = jax.random.split(key, 13)
    s = 0.1
    H, E, L = hidden_dim, embedding_dim, latent_dim
    emb = s * jax.random.normal(keys[0], (vocab_size, E), jnp.float32)
    emb = emb.at[0].set(0.0)  # padding_idx=0
    p = {
        "embedding": emb,
        "w_ih_f": s * jax.random.normal(keys[1], (4 * H, E), jnp.float32),
        "w_hh_f": s * jax.random.normal(keys[2], (4 * H, H), jnp.float32),
        "b_ih_f": s * jax.random.normal(keys[3], (4 * H,), jnp.float32),
        "b_hh_f": s * jax.random.normal(keys[4], (4 * H,), jnp.float32),
        "w_ih_b": s * jax.random.normal(keys[5], (4 * H, E), jnp.float32),
        "w_hh_b": s * jax.random.normal(keys[6], (4 * H, H), jnp.float32),
        "b_ih_b": s * jax.random.normal(keys[7], (4 * H,), jnp.float32),
        "b_hh_b": s * jax.random.normal(keys[8], (4 * H,), jnp.float32),
        "w_mean": s * jax.random.normal(keys[9], (L, 2 * H), jnp.float32),
        "b_mean": s * jax.random.normal(keys[10], (L,), jnp.float32),
        "w_logvar": s * jax.random.normal(keys[11], (L, 2 * H), jnp.float32),
        "b_logvar": s * jax.random.normal(keys[12], (L,), jnp.float32),
    }
    return p


# --------------------------------- main ----------------------------------------
if __name__ == "__main__":
    VOCAB, EMB, HID, LAT = 50, 16, 32, 8
    B, T = 2, 8

    root = jax.random.PRNGKey(0)
    k_param, k_tok, k_eps = jax.random.split(root, 3)

    params = init_params(k_param, VOCAB, EMB, HID, LAT)
    tokens = jax.random.randint(k_tok, (B, T), 0, VOCAB, dtype=jnp.int32)
    tokens = tokens.at[:, -2:].set(0)  # some padding tokens (padding_idx=0)
    # torch.randn_like(std) equivalent: deterministic noise generated in glue.
    eps = jax.random.normal(k_eps, (B, LAT), jnp.float32)

    z, mean, logvar = encoder_forward(tokens, params, eps)
    jax.block_until_ready((z, mean, logvar))

    z_r, mean_r, logvar_r = encoder_reference(tokens, params, eps)
    # bf16 MXU operands (f32 accumulation) -> slightly looser tolerance vs f32 ref.
    np.testing.assert_allclose(np.asarray(z), np.asarray(z_r), rtol=3e-2, atol=3e-2)
    np.testing.assert_allclose(np.asarray(mean), np.asarray(mean_r), rtol=3e-2, atol=3e-2)
    np.testing.assert_allclose(np.asarray(logvar), np.asarray(logvar_r), rtol=3e-2, atol=3e-2)

    print("KERNEL_OK")
</pallas_src>

<mosaic_0001>
module attributes {stable_mosaic.version = 11 : i64} {
  func.func @encoder_kernel(%arg0: i32, %arg1: memref<8x8x16xbf16, #tpu.memory_space<vmem>>, %arg2: memref<16x256xbf16, #tpu.memory_space<vmem>>, %arg3: memref<64x256xbf16, #tpu.memory_space<vmem>>, %arg4: memref<1x256xf32, #tpu.memory_space<vmem>>, %arg5: memref<64x16xbf16, #tpu.memory_space<vmem>>, %arg6: memref<1x16xf32, #tpu.memory_space<vmem>>, %arg7: memref<8x8xf32, #tpu.memory_space<vmem>>, %arg8: memref<8x24xf32, #tpu.memory_space<vmem>>, %arg9: memref<64x256xf32, #tpu.memory_space<vmem>>) attributes {dimension_semantics = [#tpu.dimension_semantics<parallel>], iteration_bounds = array<i64: 1>, scalar_prefetch = 0 : i64, scratch_operands = 1 : i64, tpu.core_type = #tpu.core_type<tc>, window_params = [{transform_indices = @transform_0, window_bounds = array<i64: 8, 8, 16>}, {pipeline_mode = #tpu.pipeline_mode<synchronous>, transform_indices = @transform_1, window_bounds = array<i64: 16, 256>}, {pipeline_mode = #tpu.pipeline_mode<synchronous>, transform_indices = @transform_2, window_bounds = array<i64: 64, 256>}, {pipeline_mode = #tpu.pipeline_mode<synchronous>, transform_indices = @transform_3, window_bounds = array<i64: 1, 256>}, {pipeline_mode = #tpu.pipeline_mode<synchronous>, transform_indices = @transform_4, window_bounds = array<i64: 64, 16>}, {pipeline_mode = #tpu.pipeline_mode<synchronous>, transform_indices = @transform_5, window_bounds = array<i64: 1, 16>}, {transform_indices = @transform_6, window_bounds = array<i64: 8, 8>}, {transform_indices = @transform_7, window_bounds = array<i64: 8, 24>}]} {
    %c0 = arith.constant 0 : index
    %c0_0 = arith.constant 0 : index
    %c0_1 = arith.constant 0 : index
    %0 = vector.load %arg1[%c0, %c0_0, %c0_1] : memref<8x8x16xbf16, #tpu.memory_space<vmem>>, vector<8x8x16xbf16>
    %1 = vector.shape_cast %0 : vector<8x8x16xbf16> to vector<64x16xbf16>
    %c0_2 = arith.constant 0 : index
    %c0_3 = arith.constant 0 : index
    %2 = vector.load %arg2[%c0_2, %c0_3] : memref<16x256xbf16, #tpu.memory_space<vmem>>, vector<16x256xbf16>
    %cst = arith.constant dense<0.000000e+00> : vector<64x256xf32>
    %3 = tpu.matmul %1, %2, %cst {dimension_numbers = #tpu.dot_dimension_numbers<[1], [0], [0], [1], [0, 0, 1, 1], [], []>} : vector<64x16xbf16>, vector<16x256xbf16>, vector<64x256xf32> -> vector<64x256xf32>
    %c0_4 = arith.constant 0 : index
    %c0_5 = arith.constant 0 : index
    %4 = vector.load %arg4[%c0_4, %c0_5] : memref<1x256xf32, #tpu.memory_space<vmem>>, vector<1x256xf32>
    %5 = vector.broadcast %4 : vector<1x256xf32> to vector<64x256xf32>
    %6 = arith.addf %3, %5 : vector<64x256xf32>
    %c0_6 = arith.constant 0 : index
    %c0_7 = arith.constant 0 : index
    %7 = vector.load %arg9[%c0_6, %c0_7] : memref<64x256xf32, #tpu.memory_space<vmem>>, vector<64x256xf32>
    tpu.vector_store %arg9[%c0_6, %c0_7], %6 {strides = array<i32>} : memref<64x256xf32, #tpu.memory_space<vmem>>, vector<64x256xf32>,
    %c0_8 = arith.constant 0 : index
    %c0_9 = arith.constant 0 : index
    %8 = vector.load %arg3[%c0_8, %c0_9] : memref<64x256xbf16, #tpu.memory_space<vmem>>, vector<64x256xbf16>
    %9 = tpu.iota {dimensions = array<i32: 1>} : vector<8x256xi32>
    %c64_i32 = arith.constant 64 : i32
    %c0_i32 = arith.constant 0 : i32
    %10 = arith.cmpi eq, %c64_i32, %c0_i32 : i32
    %c1_i32 = arith.constant 1 : i32
    %11 = arith.select %10, %c1_i32, %c64_i32 : i32
    %12 = vector.broadcast %11 : i32 to vector<8x256xi32>
    %13 = arith.remsi %9, %12 : vector<8x256xi32>
    %c0_i32_10 = arith.constant 0 : i32
    %14 = vector.broadcast %c0_i32_10 : i32 to vector<8x256xi32>
    %15 = arith.cmpi ne, %13, %14 : vector<8x256xi32>
    %c0_i32_11 = arith.constant 0 : i32
    %16 = vector.broadcast %c0_i32_11 : i32 to vector<8x256xi32>
    %17 = arith.cmpi slt, %13, %16 : vector<8x256xi32>
    %c0_i32_12 = arith.constant 0 : i32
    %18 = arith.cmpi slt, %11, %c0_i32_12 : i32
    %19 = vector.broadcast %18 : i1 to vector<8x256xi1>
    %20 = vector.broadcast %19 : vector<8x256xi1> to vector<8x256xi1>
    %21 = arith.xori %17, %20 : vector<8x256xi1>
    %22 = arith.andi %21, %15 : vector<8x256xi1>
    %23 = vector.broadcast %11 : i32 to vector<8x256xi32>
    %24 = arith.addi %13, %23 : vector<8x256xi32>
    %25 = arith.select %22, %24, %13 : vector<8x256xi1>, vector<8x256xi32>
    %c32_i32 = arith.constant 32 : i32
    %26 = vector.broadcast %c32_i32 : i32 to vector<8x256xi32>
    %27 = arith.cmpi slt, %25, %26 : vector<8x256xi32>
    %cst_13 = arith.constant 0.000000e+00 : f32
    %28 = vector.broadcast %cst_13 : f32 to vector<8x64xf32>
    %cst_14 = arith.constant 0.000000e+00 : f32
    %29 = vector.broadcast %cst_14 : f32 to vector<8x64xf32>
    %c0_i32_15 = arith.constant 0 : i32
    %c8_i32 = arith.constant 8 : i32
    %30 = arith.muli %c0_i32_15, %c8_i32 : i32
    %31 = tpu.assume_multiple %30, 8 : i32
    %c7_i32 = arith.constant 7 : i32
    %32 = arith.subi %c7_i32, %c0_i32_15 : i32
    %c8_i32_16 = arith.constant 8 : i32
    %33 = arith.muli %32, %c8_i32_16 : i32
    %34 = tpu.assume_multiple %33, 8 : i32
    %35 = arith.index_cast %31 : i32 to index
    %c0_17 = arith.constant 0 : index
    %36 = vector.load %arg9[%35, %c0_17] : memref<64x256xf32, #tpu.memory_space<vmem>>, vector<8x256xf32>
    %37 = arith.index_cast %34 : i32 to index
    %c0_18 = arith.constant 0 : index
    %38 = vector.load %arg9[%37, %c0_18] : memref<64x256xf32, #tpu.memory_space<vmem>>, vector<8x256xf32>
    %39 = arith.select %27, %36, %38 : vector<8x256xi1>, vector<8x256xf32>
    %40 = arith.truncf %28 : vector<8x64xf32> to vector<8x64xbf16>
    %cst_19 = arith.constant dense<0.000000e+00> : vector<8x256xf32>
    %41 = tpu.matmul %40, %8, %cst_19 {dimension_numbers = #tpu.dot_dimension_numbers<[1], [0], [0], [1], [0, 0, 1, 1], [], []>} : vector<8x64xbf16>, vector<64x256xbf16>, vector<8x256xf32> -> vector<8x256xf32>
    %42 = arith.addf %41, %39 : vector<8x256xf32>
    %43 = vector.extract_strided_slice %42 {offsets = [0, 0], sizes = [8, 192], strides = [1, 1]} : vector<8x256xf32> to vector<8x192xf32>
    %44 = arith.negf %43 : vector<8x192xf32>
    %45 = math.exp %44 : vector<8x192xf32>
    %cst_20 = arith.constant 1.000000e+00 : f32
    %46 = vector.broadcast %cst_20 : f32 to vector<8x192xf32>
    %47 = arith.addf %46, %45 : vector<8x192xf32>
    %48 = arith.divf %46, %47 : vector<8x192xf32>
    %49 = vector.extract_strided_slice %42 {offsets = [0, 192], sizes = [8, 64], strides = [1, 1]} : vector<8x256xf32> to vector<8x64xf32>
    %50 = math.tanh %49 : vector<8x64xf32>
    %51 = vector.extract_strided_slice %48 {offsets = [0, 0], sizes = [8, 64], strides = [1, 1]} : vector<8x192xf32> to vector<8x64xf32>
    %52 = vector.extract_strided_slice %48 {offsets = [0, 64], sizes = [8, 64], strides = [1, 1]} : vector<8x192xf32> to vector<8x64xf32>
    %53 = vector.extract_strided_slice %48 {offsets = [0, 128], sizes = [8, 64], strides = [1, 1]} : vector<8x192xf32> to vector<8x64xf32>
    %54 = arith.mulf %52, %29 : vector<8x64xf32>
    %55 = arith.mulf %51, %50 : vector<8x64xf32>
    %56 = arith.addf %54, %55 : vector<8x64xf32>
    %57 = math.tanh %56 : vector<8x64xf32>
    %58 = arith.mulf %53, %57 : vector<8x64xf32>
    %c1_i32_21 = arith.constant 1 : i32
    %c8_i32_22 = arith.constant 8 : i32
    %59 = arith.muli %c1_i32_21, %c8_i32_22 : i32
    %60 = tpu.assume_multiple %59, 8 : i32
    %c7_i32_23 = arith.constant 7 : i32
    %61 = arith.subi %c7_i32_23, %c1_i32_21 : i32
    %c8_i32_24 = arith.constant 8 : i32
    %62 = arith.muli %61, %c8_i32_24 : i32
    %63 = tpu.assume_multiple %62, 8 : i32
    %64 = arith.index_cast %60 : i32 to index
    %c0_25 = arith.constant 0 : index
    %65 = vector.load %arg9[%64, %c0_25] : memref<64x256xf32, #tpu.memory_space<vmem>>, vector<8x256xf32>
    %66 = arith.index_cast %63 : i32 to index
    %c0_26 = arith.constant 0 : index
    %67 = vector.load %arg9[%66, %c0_26] : memref<64x256xf32, #tpu.memory_space<vmem>>, vector<8x256xf32>
    %68 = arith.select %27, %65, %67 : vector<8x256xi1>, vector<8x256xf32>
    %69 = arith.truncf %58 : vector<8x64xf32> to vector<8x64xbf16>
    %cst_27 = arith.constant dense<0.000000e+00> : vector<8x256xf32>
    %70 = tpu.matmul %69, %8, %cst_27 {dimension_numbers = #tpu.dot_dimension_numbers<[1], [0], [0], [1], [0, 0, 1, 1], [], []>} : vector<8x64xbf16>, vector<64x256xbf16>, vector<8x256xf32> -> vector<8x256xf32>
    %71 = arith.addf %70, %68 : vector<8x256xf32>
    %72 = vector.extract_strided_slice %71 {offsets = [0, 0], sizes = [8, 192], strides = [1, 1]} : vector<8x256xf32> to vector<8x192xf32>
    %73 = arith.negf %72 : vector<8x192xf32>
    %74 = math.exp %73 : vector<8x192xf32>
    %cst_28 = arith.constant 1.000000e+00 : f32
    %75 = vector.broadcast %cst_28 : f32 to vector<8x192xf32>
    %76 = arith.addf %75, %74 : vector<8x192xf32>
    %77 = arith.divf %75, %76 : vector<8x192xf32>
    %78 = vector.extract_strided_slice %71 {offsets = [0, 192], sizes = [8, 64], strides = [1, 1]} : vector<8x256xf32> to vector<8x64xf32>
    %79 = math.tanh %78 : vector<8x64xf32>
    %80 = vector.extract_strided_slice %77 {offsets = [0, 0], sizes = [8, 64], strides = [1, 1]} : vector<8x192xf32> to vector<8x64xf32>
    %81 = vector.extract_strided_slice %77 {offsets = [0, 64], sizes = [8, 64], strides = [1, 1]} : vector<8x192xf32> to vector<8x64xf32>
    %82 = vector.extract_strided_slice %77 {offsets = [0, 128], sizes = [8, 64], strides = [1, 1]} : vector<8x192xf32> to vector<8x64xf32>
    %83 = arith.mulf %81, %56 : vector<8x64xf32>
    %84 = arith.mulf %80, %79 : vector<8x64xf32>
    %85 = arith.addf %83, %84 : vector<8x64xf32>
    %86 = math.tanh %85 : vector<8x64xf32>
    %87 = arith.mulf %82, %86 : vector<8x64xf32>
    %c2_i32 = arith.constant 2 : i32
    %c8_i32_29 = arith.constant 8 : i32
    %88 = arith.muli %c2_i32, %c8_i32_29 : i32
    %89 = tpu.assume_multiple %88, 8 : i32
    %c7_i32_30 = arith.constant 7 : i32
    %90 = arith.subi %c7_i32_30, %c2_i32 : i32
    %c8_i32_31 = arith.constant 8 : i32
    %91 = arith.muli %90, %c8_i32_31 : i32
    %92 = tpu.assume_multiple %91, 8 : i32
    %93 = arith.index_cast %89 : i32 to index
    %c0_32 = arith.constant 0 : index
    %94 = vector.load %arg9[%93, %c0_32] : memref<64x256xf32, #tpu.memory_space<vmem>>, vector<8x256xf32>
    %95 = arith.index_cast %92 : i32 to index
    %c0_33 = arith.constant 0 : index
    %96 = vector.load %arg9[%95, %c0_33] : memref<64x256xf32, #tpu.memory_space<vmem>>, vector<8x256xf32>
    %97 = arith.select %27, %94, %96 : vector<8x256xi1>, vector<8x256xf32>
    %98 = arith.truncf %87 : vector<8x64xf32> to vector<8x64xbf16>
    %cst_34 = arith.constant dense<0.000000e+00> : vector<8x256xf32>
    %99 = tpu.matmul %98, %8, %cst_34 {dimension_numbers = #tpu.dot_dimension_numbers<[1], [0], [0], [1], [0, 0, 1, 1], [], []>} : vector<8x64xbf16>, vector<64x256xbf16>, vector<8x256xf32> -> vector<8x256xf32>
    %100 = arith.addf %99, %97 : vector<8x256xf32>
    %101 = vector.extract_strided_slice %100 {offsets = [0, 0], sizes = [8, 192], strides = [1, 1]} : vector<8x256xf32> to vector<8x192xf32>
    %102 = arith.negf %101 : vector<8x192xf32>
    %103 = math.exp %102 : vector<8x192xf32>
    %cst_35 = arith.constant 1.000000e+00 : f32
    %104 = vector.broadcast %cst_35 : f32 to vector<8x192xf32>
    %105 = arith.addf %104, %103 : vector<8x192xf32>
    %106 = arith.divf %104, %105 : vector<8x192xf32>
    %107 = vector.extract_strided_slice %100 {offsets = [0, 192], sizes = [8, 64], strides = [1, 1]} : vector<8x256xf32> to vector<8x64xf32>
    %108 = math.tanh %107 : vector<8x64xf32>
    %109 = vector.extract_strided_slice %106 {offsets = [0, 0], sizes = [8, 64], strides = [1, 1]} : vector<8x192xf32> to vector<8x64xf32>
    %110 = vector.extract_strided_slice %106 {offsets = [0, 64], sizes = [8, 64], strides = [1, 1]} : vector<8x192xf32> to vector<8x64xf32>
    %111 = vector.extract_strided_slice %106 {offsets = [0, 128], sizes = [8, 64], strides = [1, 1]} : vector<8x192xf32> to vector<8x64xf32>
    %112 = arith.mulf %110, %85 : vector<8x64xf32>
    %113 = arith.mulf %109, %108 : vector<8x64xf32>
    %114 = arith.addf %112, %113 : vector<8x64xf32>
    %115 = math.tanh %114 : vector<8x64xf32>
    %116 = arith.mulf %111, %115 : vector<8x64xf32>
    %c3_i32 = arith.constant 3 : i32
    %c8_i32_36 = arith.constant 8 : i32
    %117 = arith.muli %c3_i32, %c8_i32_36 : i32
    %118 = tpu.assume_multiple %117, 8 : i32
    %c7_i32_37 = arith.constant 7 : i32
    %119 = arith.subi %c7_i32_37, %c3_i32 : i32
    %c8_i32_38 = arith.constant 8 : i32
    %120 = arith.muli %119, %c8_i32_38 : i32
    %121 = tpu.assume_multiple %120, 8 : i32
    %122 = arith.index_cast %118 : i32 to index
    %c0_39 = arith.constant 0 : index
    %123 = vector.load %arg9[%122, %c0_39] : memref<64x256xf32, #tpu.memory_space<vmem>>, vector<8x256xf32>
    %124 = arith.index_cast %121 : i32 to index
    %c0_40 = arith.constant 0 : index
    %125 = vector.load %arg9[%124, %c0_40] : memref<64x256xf32, #tpu.memory_space<vmem>>, vector<8x256xf32>
    %126 = arith.select %27, %123, %125 : vector<8x256xi1>, vector<8x256xf32>
    %127 = arith.truncf %116 : vector<8x64xf32> to vector<8x64xbf16>
    %cst_41 = arith.constant dense<0.000000e+00> : vector<8x256xf32>
    %128 = tpu.matmul %127, %8, %cst_41 {dimension_numbers = #tpu.dot_dimension_numbers<[1], [0], [0], [1], [0, 0, 1, 1], [], []>} : vector<8x64xbf16>, vector<64x256xbf16>, vector<8x256xf32> -> vector<8x256xf32>
    %129 = arith.addf %128, %126 : vector<8x256xf32>
    %130 = vector.extract_strided_slice %129 {offsets = [0, 0], sizes = [8, 192], strides = [1, 1]} : vector<8x256xf32> to vector<8x192xf32>
    %131 = arith.negf %130 : vector<8x192xf32>
    %132 = math.exp %131 : vector<8x192xf32>
    %cst_42 = arith.constant 1.000000e+00 : f32
    %133 = vector.broadcast %cst_42 : f32 to vector<8x192xf32>
    %134 = arith.addf %133, %132 : vector<8x192xf32>
    %135 = arith.divf %133, %134 : vector<8x192xf32>
    %136 = vector.extract_strided_slice %129 {offsets = [0, 192], sizes = [8, 64], strides = [1, 1]} : vector<8x256xf32> to vector<8x64xf32>
    %137 = math.tanh %136 : vector<8x64xf32>
    %138 = vector.extract_strided_slice %135 {offsets = [0, 0], sizes = [8, 64], strides = [1, 1]} : vector<8x192xf32> to vector<8x64xf32>
    %139 = vector.extract_strided_slice %135 {offsets = [0, 64], sizes = [8, 64], strides = [1, 1]} : vector<8x192xf32> to vector<8x64xf32>
    %140 = vector.extract_strided_slice %135 {offsets = [0, 128], sizes = [8, 64], strides = [1, 1]} : vector<8x192xf32> to vector<8x64xf32>
    %141 = arith.mulf %139, %114 : vector<8x64xf32>
    %142 = arith.mulf %138, %137 : vector<8x64xf32>
    %143 = arith.addf %141, %142 : vector<8x64xf32>
    %144 = math.tanh %143 : vector<8x64xf32>
    %145 = arith.mulf %140, %144 : vector<8x64xf32>
    %c4_i32 = arith.constant 4 : i32
    %c8_i32_43 = arith.constant 8 : i32
    %146 = arith.muli %c4_i32, %c8_i32_43 : i32
    %147 = tpu.assume_multiple %146, 8 : i32
    %c7_i32_44 = arith.constant 7 : i32
    %148 = arith.subi %c7_i32_44, %c4_i32 : i32
    %c8_i32_45 = arith.constant 8 : i32
    %149 = arith.muli %148, %c8_i32_45 : i32
    %150 = tpu.assume_multiple %149, 8 : i32
    %151 = arith.index_cast %147 : i32 to index
    %c0_46 = arith.constant 0 : index
    %152 = vector.load %arg9[%151, %c0_46] : memref<64x256xf32, #tpu.memory_space<vmem>>, vector<8x256xf32>
    %153 = arith.index_cast %150 : i32 to index
    %c0_47 = arith.constant 0 : index
    %154 = vector.load %arg9[%153, %c0_47] : memref<64x256xf32, #tpu.memory_space<vmem>>, vector<8x256xf32>
    %155 = arith.select %27, %152, %154 : vector<8x256xi1>, vector<8x256xf32>
    %156 = arith.truncf %145 : vector<8x64xf32> to vector<8x64xbf16>
    %cst_48 = arith.constant dense<0.000000e+00> : vector<8x256xf32>
    %157 = tpu.matmul %156, %8, %cst_48 {dimension_numbers = #tpu.dot_dimension_numbers<[1], [0], [0], [1], [0, 0, 1, 1], [], []>} : vector<8x64xbf16>, vector<64x256xbf16>, vector<8x256xf32> -> vector<8x256xf32>
    %158 = arith.addf %157, %155 : vector<8x256xf32>
    %159 = vector.extract_strided_slice %158 {offsets = [0, 0], sizes = [8, 192], strides = [1, 1]} : vector<8x256xf32> to vector<8x192xf32>
    %160 = arith.negf %159 : vector<8x192xf32>
    %161 = math.exp %160 : vector<8x192xf32>
    %cst_49 = arith.constant 1.000000e+00 : f32
    %162 = vector.broadcast %cst_49 : f32 to vector<8x192xf32>
    %163 = arith.addf %162, %161 : vector<8x192xf32>
    %164 = arith.divf %162, %163 : vector<8x192xf32>
    %165 = vector.extract_strided_slice %158 {offsets = [0, 192], sizes = [8, 64], strides = [1, 1]} : vector<8x256xf32> to vector<8x64xf32>
    %166 = math.tanh %165 : vector<8x64xf32>
    %167 = vector.extract_strided_slice %164 {offsets = [0, 0], sizes = [8, 64], strides = [1, 1]} : vector<8x192xf32> to vector<8x64xf32>
    %168 = vector.extract_strided_slice %164 {offsets = [0, 64], sizes = [8, 64], strides = [1, 1]} : vector<8x192xf32> to vector<8x64xf32>
    %169 = vector.extract_strided_slice %164 {offsets = [0, 128], sizes = [8, 64], strides = [1, 1]} : vector<8x192xf32> to vector<8x64xf32>
    %170 = arith.mulf %168, %143 : vector<8x64xf32>
    %171 = arith.mulf %167, %166 : vector<8x64xf32>
    %172 = arith.addf %170, %171 : vector<8x64xf32>
    %173 = math.tanh %172 : vector<8x64xf32>
    %174 = arith.mulf %169, %173 : vector<8x64xf32>
    %c5_i32 = arith.constant 5 : i32
    %c8_i32_50 = arith.constant 8 : i32
    %175 = arith.muli %c5_i32, %c8_i32_50 : i32
    %176 = tpu.assume_multiple %175, 8 : i32
    %c7_i32_51 = arith.constant 7 : i32
    %177 = arith.subi %c7_i32_51, %c5_i32 : i32
    %c8_i32_52 = arith.constant 8 : i32
    %178 = arith.muli %177, %c8_i32_52 : i32
    %179 = tpu.assume_multiple %178, 8 : i32
    %180 = arith.index_cast %176 : i32 to index
    %c0_53 = arith.constant 0 : index
    %181 = vector.load %arg9[%180, %c0_53] : memref<64x256xf32, #tpu.memory_space<vmem>>, vector<8x256xf32>
    %182 = arith.index_cast %179 : i32 to index
    %c0_54 = arith.constant 0 : index
    %183 = vector.load %arg9[%182, %c0_54] : memref<64x256xf32, #tpu.memory_space<vmem>>, vector<8x256xf32>
    %184 = arith.select %27, %181, %183 : vector<8x256xi1>, vector<8x256xf32>
    %185 = arith.truncf %174 : vector<8x64xf32> to vector<8x64xbf16>
    %cst_55 = arith.constant dense<0.000000e+00> : vector<8x256xf32>
    %186 = tpu.matmul %185, %8, %cst_55 {dimension_numbers = #tpu.dot_dimension_numbers<[1], [0], [0], [1], [0, 0, 1, 1], [], []>} : vector<8x64xbf16>, vector<64x256xbf16>, vector<8x256xf32> -> vector<8x256xf32>
    %187 = arith.addf %186, %184 : vector<8x256xf32>
    %188 = vector.extract_strided_slice %187 {offsets = [0, 0], sizes = [8, 192], strides = [1, 1]} : vector<8x256xf32> to vector<8x192xf32>
    %189 = arith.negf %188 : vector<8x192xf32>
    %190 = math.exp %189 : vector<8x192xf32>
    %cst_56 = arith.constant 1.000000e+00 : f32
    %191 = vector.broadcast %cst_56 : f32 to vector<8x192xf32>
    %192 = arith.addf %191, %190 : vector<8x192xf32>
    %193 = arith.divf %191, %192 : vector<8x192xf32>
    %194 = vector.extract_strided_slice %187 {offsets = [0, 192], sizes = [8, 64], strides = [1, 1]} : vector<8x256xf32> to vector<8x64xf32>
    %195 = math.tanh %194 : vector<8x64xf32>
    %196 = vector.extract_strided_slice %193 {offsets = [0, 0], sizes = [8, 64], strides = [1, 1]} : vector<8x192xf32> to vector<8x64xf32>
    %197 = vector.extract_strided_slice %193 {offsets = [0, 64], sizes = [8, 64], strides = [1, 1]} : vector<8x192xf32> to vector<8x64xf32>
    %198 = vector.extract_strided_slice %193 {offsets = [0, 128], sizes = [8, 64], strides = [1, 1]} : vector<8x192xf32> to vector<8x64xf32>
    %199 = arith.mulf %197, %172 : vector<8x64xf32>
    %200 = arith.mulf %196, %195 : vector<8x64xf32>
    %201 = arith.addf %199, %200 : vector<8x64xf32>
    %202 = math.tanh %201 : vector<8x64xf32>
    %203 = arith.mulf %198, %202 : vector<8x64xf32>
    %c6_i32 = arith.constant 6 : i32
    %c8_i32_57 = arith.constant 8 : i32
    %204 = arith.muli %c6_i32, %c8_i32_57 : i32
    %205 = tpu.assume_multiple %204, 8 : i32
    %c7_i32_58 = arith.constant 7 : i32
    %206 = arith.subi %c7_i32_58, %c6_i32 : i32
    %c8_i32_59 = arith.constant 8 : i32
    %207 = arith.muli %206, %c8_i32_59 : i32
    %208 = tpu.assume_multiple %207, 8 : i32
    %209 = arith.index_cast %205 : i32 to index
    %c0_60 = arith.constant 0 : index
    %210 = vector.load %arg9[%209, %c0_60] : memref<64x256xf32, #tpu.memory_space<vmem>>, vector<8x256xf32>
    %211 = arith.index_cast %208 : i32 to index
    %c0_61 = arith.constant 0 : index
    %212 = vector.load %arg9[%211, %c0_61] : memref<64x256xf32, #tpu.memory_space<vmem>>, vector<8x256xf32>
    %213 = arith.select %27, %210, %212 : vector<8x256xi1>, vector<8x256xf32>
    %214 = arith.truncf %203 : vector<8x64xf32> to vector<8x64xbf16>
    %cst_62 = arith.constant dense<0.000000e+00> : vector<8x256xf32>
    %215 = tpu.matmul %214, %8, %cst_62 {dimension_numbers = #tpu.dot_dimension_numbers<[1], [0], [0], [1], [0, 0, 1, 1], [], []>} : vector<8x64xbf16>, vector<64x256xbf16>, vector<8x256xf32> -> vector<8x256xf32>
    %216 = arith.addf %215, %213 : vector<8x256xf32>
    %217 = vector.extract_strided_slice %216 {offsets = [0, 0], sizes = [8, 192], strides = [1, 1]} : vector<8x256xf32> to vector<8x192xf32>
    %218 = arith.negf %217 : vector<8x192xf32>
    %219 = math.exp %218 : vector<8x192xf32>
    %cst_63 = arith.constant 1.000000e+00 : f32
    %220 = vector.broadcast %cst_63 : f32 to vector<8x192xf32>
    %221 = arith.addf %220, %219 : vector<8x192xf32>
    %222 = arith.divf %220, %221 : vector<8x192xf32>
    %223 = vector.extract_strided_slice %216 {offsets = [0, 192], sizes = [8, 64], strides = [1, 1]} : vector<8x256xf32> to vector<8x64xf32>
    %224 = math.tanh %223 : vector<8x64xf32>
    %225 = vector.extract_strided_slice %222 {offsets = [0, 0], sizes = [8, 64], strides = [1, 1]} : vector<8x192xf32> to vector<8x64xf32>
    %226 = vector.extract_strided_slice %222 {offsets = [0, 64], sizes = [8, 64], strides = [1, 1]} : vector<8x192xf32> to vector<8x64xf32>
    %227 = vector.extract_strided_slice %222 {offsets = [0, 128], sizes = [8, 64], strides = [1, 1]} : vector<8x192xf32> to vector<8x64xf32>
    %228 = arith.mulf %226, %201 : vector<8x64xf32>
    %229 = arith.mulf %225, %224 : vector<8x64xf32>
    %230 = arith.addf %228, %229 : vector<8x64xf32>
    %231 = math.tanh %230 : vector<8x64xf32>
    %232 = arith.mulf %227, %231 : vector<8x64xf32>
    %c7_i32_64 = arith.constant 7 : i32
    %c8_i32_65 = arith.constant 8 : i32
    %233 = arith.muli %c7_i32_64, %c8_i32_65 : i32
    %234 = tpu.assume_multiple %233, 8 : i32
    %c7_i32_66 = arith.constant 7 : i32
    %235 = arith.subi %c7_i32_66, %c7_i32_64 : i32
    %c8_i32_67 = arith.constant 8 : i32
    %236 = arith.muli %235, %c8_i32_67 : i32
    %237 = tpu.assume_multiple %236, 8 : i32
    %238 = arith.index_cast %234 : i32 to index
    %c0_68 = arith.constant 0 : index
    %239 = vector.load %arg9[%238, %c0_68] : memref<64x256xf32, #tpu.memory_space<vmem>>, vector<8x256xf32>
    %240 = arith.index_cast %237 : i32 to index
    %c0_69 = arith.constant 0 : index
    %241 = vector.load %arg9[%240, %c0_69] : memref<64x256xf32, #tpu.memory_space<vmem>>, vector<8x256xf32>
    %242 = arith.select %27, %239, %241 : vector<8x256xi1>, vector<8x256xf32>
    %243 = arith.truncf %232 : vector<8x64xf32> to vector<8x64xbf16>
    %cst_70 = arith.constant dense<0.000000e+00> : vector<8x256xf32>
    %244 = tpu.matmul %243, %8, %cst_70 {dimension_numbers = #tpu.dot_dimension_numbers<[1], [0], [0], [1], [0, 0, 1, 1], [], []>} : vector<8x64xbf16>, vector<64x256xbf16>, vector<8x256xf32> -> vector<8x256xf32>
    %245 = arith.addf %244, %242 : vector<8x256xf32>
    %246 = vector.extract_strided_slice %245 {offsets = [0, 0], sizes = [8, 192], strides = [1, 1]} : vector<8x256xf32> to vector<8x192xf32>
    %247 = arith.negf %246 : vector<8x192xf32>
    %248 = math.exp %247 : vector<8x192xf32>
    %cst_71 = arith.constant 1.000000e+00 : f32
    %249 = vector.broadcast %cst_71 : f32 to vector<8x192xf32>
    %250 = arith.addf %249, %248 : vector<8x192xf32>
    %251 = arith.divf %249, %250 : vector<8x192xf32>
    %252 = vector.extract_strided_slice %245 {offsets = [0, 192], sizes = [8, 64], strides = [1, 1]} : vector<8x256xf32> to vector<8x64xf32>
    %253 = math.tanh %252 : vector<8x64xf32>
    %254 = vector.extract_strided_slice %251 {offsets = [0, 0], sizes = [8, 64], strides = [1, 1]} : vector<8x192xf32> to vector<8x64xf32>
    %255 = vector.extract_strided_slice %251 {offsets = [0, 64], sizes = [8, 64], strides = [1, 1]} : vector<8x192xf32> to vector<8x64xf32>
    %256 = vector.extract_strided_slice %251 {offsets = [0, 128], sizes = [8, 64], strides = [1, 1]} : vector<8x192xf32> to vector<8x64xf32>
    %257 = arith.mulf %255, %230 : vector<8x64xf32>
    %258 = arith.mulf %254, %253 : vector<8x64xf32>
    %259 = arith.addf %257, %258 : vector<8x64xf32>
    %260 = math.tanh %259 : vector<8x64xf32>
    %261 = arith.mulf %256, %260 : vector<8x64xf32>
    %c8_i32_72 = arith.constant 8 : i32
    %262 = arith.truncf %261 : vector<8x64xf32> to vector<8x64xbf16>
    %c0_73 = arith.constant 0 : index
    %c0_74 = arith.constant 0 : index
    %263 = vector.load %arg5[%c0_73, %c0_74] : memref<64x16xbf16, #tpu.memory_space<vmem>>, vector<64x16xbf16>
    %cst_75 = arith.constant dense<0.000000e+00> : vector<8x16xf32>
    %264 = tpu.matmul %262, %263, %cst_75 {dimension_numbers = #tpu.dot_dimension_numbers<[1], [0], [0], [1], [0, 0, 1, 1], [], []>} : vector<8x64xbf16>, vector<64x16xbf16>, vector<8x16xf32> -> vector<8x16xf32>
    %c0_76 = arith.constant 0 : index
    %c0_77 = arith.constant 0 : index
    %265 = vector.load %arg6[%c0_76, %c0_77] : memref<1x16xf32, #tpu.memory_space<vmem>>, vector<1x16xf32>
    %266 = vector.broadcast %265 : vector<1x16xf32> to vector<8x16xf32>
    %267 = arith.addf %264, %266 : vector<8x16xf32>
    %268 = vector.extract_strided_slice %267 {offsets = [0, 0], sizes = [8, 8], strides = [1, 1]} : vector<8x16xf32> to vector<8x8xf32>
    %269 = vector.extract_strided_slice %267 {offsets = [0, 8], sizes = [8, 8], strides = [1, 1]} : vector<8x16xf32> to vector<8x8xf32>
    %c0_78 = arith.constant 0 : index
    %c0_79 = arith.constant 0 : index
    %270 = vector.load %arg7[%c0_78, %c0_79] : memref<8x8xf32, #tpu.memory_space<vmem>>, vector<8x8xf32>
    %cst_80 = arith.constant 5.000000e-01 : f32
    %271 = vector.broadcast %cst_80 : f32 to vector<8x8xf32>
    %272 = arith.mulf %271, %269 : vector<8x8xf32>
    %273 = math.exp %272 : vector<8x8xf32>
    %274 = arith.mulf %270, %273 : vector<8x8xf32>
    %275 = arith.addf %268, %274 : vector<8x8xf32>
    %276 = tpu.concatenate %275, %268, %269 in 1 : vector<8x8xf32>, vector<8x8xf32>, vector<8x8xf32> -> vector<8x24xf32>
    %c0_81 = arith.constant 0 : index
    %c0_82 = arith.constant 0 : index
    %277 = vector.load %arg8[%c0_81, %c0_82] : memref<8x24xf32, #tpu.memory_space<vmem>>, vector<8x24xf32>
    tpu.vector_store %arg8[%c0_81, %c0_82], %276 {strides = array<i32>} : memref<8x24xf32, #tpu.memory_space<vmem>>, vector<8x24xf32>,
    return
  }
  func.func @transform_0(%arg0: i32) -> (i32, i32, i32) {
    %c0_i32 = arith.constant 0 : i32
    %c0_i32_0 = arith.constant 0 : i32
    %c0_i32_1 = arith.constant 0 : i32
    return %c0_i32, %arg0, %c0_i32_0 : i32, i32, i32
  }
  func.func @transform_1(%arg0: i32) -> (i32, i32) {
    %c0_i32 = arith.constant 0 : i32
    %c0_i32_0 = arith.constant 0 : i32
    %c0_i32_1 = arith.constant 0 : i32
    return %c0_i32, %c0_i32_0 : i32, i32
  }
  func.func @transform_2(%arg0: i32) -> (i32, i32) {
    %c0_i32 = arith.constant 0 : i32
    %c0_i32_0 = arith.constant 0 : i32
    %c0_i32_1 = arith.constant 0 : i32
    return %c0_i32, %c0_i32_0 : i32, i32
  }
  func.func @transform_3(%arg0: i32) -> (i32, i32) {
    %c0_i32 = arith.constant 0 : i32
    %c0_i32_0 = arith.constant 0 : i32
    %c0_i32_1 = arith.constant 0 : i32
    return %c0_i32, %c0_i32_0 : i32, i32
  }
  func.func @transform_4(%arg0: i32) -> (i32, i32) {
    %c0_i32 = arith.constant 0 : i32
    %c0_i32_0 = arith.constant 0 : i32
    %c0_i32_1 = arith.constant 0 : i32
    return %c0_i32, %c0_i32_0 : i32, i32
  }
  func.func @transform_5(%arg0: i32) -> (i32, i32) {
    %c0_i32 = arith.constant 0 : i32
    %c0_i32_0 = arith.constant 0 : i32
    %c0_i32_1 = arith.constant 0 : i32
    return %c0_i32, %c0_i32_0 : i32, i32
  }
  func.func @transform_6(%arg0: i32) -> (i32, i32) {
    %c0_i32 = arith.constant 0 : i32
    %c0_i32_0 = arith.constant 0 : i32
    return %arg0, %c0_i32 : i32, i32
  }
  func.func @transform_7(%arg0: i32) -> (i32, i32) {
    %c0_i32 = arith.constant 0 : i32
    %c0_i32_0 = arith.constant 0 : i32
    return %arg0, %c0_i32 : i32, i32
  }
}

</mosaic_0001>

<bundles_post_ra>
// kernel: tpu_custom_call.1
= control target key start
LH: loop header
LB: loop body
LE: loop exit
PB: predicated region body
PF: predicated region fallthrough
CT: control target
= control target key end

     0   :  { %12 = vsyncpa [#allocation4], 0  ;;  %s1751_s0 = inlined_call_operand.vmem [shape: bf16[8,8,16], index: 0, kind: input, shape index: {}]   ;;  %s1752_s1 = inlined_call_operand.hbm [shape: bf16[16,256], index: 1, kind: input, shape index: {}]   ;;  %s1753_s2 = inlined_call_operand.hbm [shape: bf16[64,256], index: 2, kind: input, shape index: {}]   ;;  %s1754_s3 = inlined_call_operand.vmem [shape: f32[1,256], index: 3, kind: input, shape index: {}]   ;;  %s1755_s4 = inlined_call_operand.vmem [shape: bf16[64,16], index: 4, kind: input, shape index: {}]   ;;  %s1756_s5 = inlined_call_operand.vmem [shape: f32[1,16], index: 5, kind: input, shape index: {}]   ;;  %s1757_s6 = inlined_call_operand.vmem [shape: f32[8,8], index: 6, kind: input, shape index: {}]   ;;  %s1758_s7 = inlined_call_operand.hbm [shape: f32[8,24], index: 7, kind: output, shape index: {}]  }
   0x1   :  { %13 = vsyncpa [#allocation7], 0 }
   0x2   :  { %14 = vsyncpa [#allocation5], 0  ;;  %s1335_s24 = smov [#allocation3]   ;;  %s1263_s28 = scalar_lea.hbm %s1752_s1, 256 }
   0x3   :  { %s22_s25 = sshll.u32 %s1335_s24, 4  ;;  %p1264_p0 = scmp.ne.s32.totalorder %s1752_s1, %s1263_s28  ;;  %s23_s25 = int_to_ptr.vmem [resolvable:$true] %s22_s25 }
   0x4   :  { %p1267_p1 = scmp.lt.u32.totalorder %s1263_s28, %s1752_s1 }
   0x6   :  { %p1269_p2 = pnand %p1267_p1, %p1264_p0 }
   0x8   :  { %1272 = shalt.err (!%p1269_p2)
}
   0x9   :  { %s1273_s10 = scalar_lea.vmem %s23_s25, 256  ;;  %p1278_p4 = scmp.lt.s32.totalorder %s23_s25, %s23_s25 }
   0xa   :  { %p1274_p3 = scmp.ne.s32.totalorder %s23_s25, %s1273_s10  ;;  %p1279_p5 = scmp.lt.s32.totalorder %s1273_s10, %s1273_s10 }
   0xc   :  { %p1280_p6 = por %p1279_p5, %p1278_p4 }
   0xe   :  { %p1281_p7 = pnand %p1280_p6, %p1274_p3 }
  0x10   :  { %1284 = shalt.err (!%p1281_p7)
}
  0x11   :  { %s1336_s11 = smov 128   ;;  %s1337_s12 = smov 8  }
  0x12   :  { %28 = dma.hbm_to_vmem [thread:$0]  %s1752_s1, 256, %s23_s25, [#allocation4], %s1336_s11, %s1336_s11, %s1337_s12  }
  0x13   :  { %s1338_s15 = smov [#allocation6]   ;;  %s1285_s19 = scalar_lea.hbm %s1753_s2, 1024 }
  0x14   :  { %s34_s16 = sshll.u32 %s1338_s15, 4  ;;  %p1286_p8 = scmp.ne.s32.totalorder %s1753_s2, %s1285_s19  ;;  %s35_s16 = int_to_ptr.vmem [resolvable:$true] %s34_s16 }
  0x15   :  { %p1289_p9 = scmp.lt.u32.totalorder %s1285_s19, %s1753_s2 }
  0x17   :  { %p1291_p10 = pnand %p1289_p9, %p1286_p8 }
  0x19   :  { %1294 = shalt.err (!%p1291_p10)
}
  0x1a   :  { %s1295_s24 = scalar_lea.vmem %s35_s16, 1024  ;;  %p1300_p12 = scmp.lt.s32.totalorder %s35_s16, %s35_s16 }
  0x1b   :  { %p1296_p11 = scmp.ne.s32.totalorder %s35_s16, %s1295_s24  ;;  %p1301_p13 = scmp.lt.s32.totalorder %s1295_s24, %s1295_s24 }
  0x1d   :  { %p1302_p0 = por %p1301_p13, %p1300_p12 }
  0x1f   :  { %p1303_p1 = pnand %p1302_p0, %p1296_p11 }
  0x21   :  { %1306 = shalt.err (!%p1303_p1)
}
  0x22   :  { %40 = dma.hbm_to_vmem [thread:$0]  %s1753_s2, 1024, %s35_s16, [#allocation7], %s1336_s11, %s1336_s11, %s1337_s12  }
  0x23   :  { %1329 = dma.done.wait [#allocation4], 256  }
  0x24   :  { %1330 = vsyncadd [#allocation4], 4294967040 }
  0x25   :  { %1331 = dma.done.wait [#allocation7], 1024  }
  0x26   :  { %1332 = vsyncadd [#allocation7], 4294966272  ;;  %v1339_v0 = vmov 0   ;;  %v1142_v1 = vld [vmem:[#allocation3 + $0x4] ss:$8 sps:$4 sm:$0xff]   ;;  %vm108_vm0 = vcmask 130048   ;;  %v68_v15 = vlaneseq }
  0x27   :  { %153 = vmatprep.mubr.bf16.mxu0 %v1339_v0  ;;  %335 = vmatprep.mubr.bf16.mxu1 %v1339_v0  ;;  %v1144_v2 = vld [vmem:[#allocation3] ss:$8 sps:$4 sm:$0xff]   ;;  %v1416_v4 = vld [vmem:[#allocation6 + $0x4] ss:$8 sps:$4 sm:$0xff]   ;;  %v1418_v5 = vld [vmem:[#allocation6] ss:$8 sps:$4 sm:$0xff]  }
  0x28   :  { %121 = vmatprep.subr.bf16.mxu0 %v1142_v1  ;;  %v1145_v3 = vld [vmem:[%s1751_s0] sm:$0xff]   ;;  %303 = vmatprep.subr.bf16.mxu1 %v1416_v4  ;;  %v1429_v8 = vld [vmem:[#allocation6 + $0x24] ss:$8 sps:$4 sm:$0xff]   ;;  %v1146_v9 = vld [vmem:[%s1751_s0 + $0x8] sm:$0xff]   ;;  %v69_v16 = vshrl.u32 %v68_v15, 7  ;;  %v219_v28 = vand.u32 127, %v68_v15 }
  0x29   :  { %122 = vmatpush1.bf16.msra.mxu0 %v1144_v2  ;;  %v1420_v6 = vld [vmem:[#allocation6 + $0x14] ss:$8 sps:$4 sm:$0xff]   ;;  %304 = vmatpush1.bf16.msra.mxu1 %v1418_v5  ;;  %v1426_v7 = vld [vmem:[#allocation6 + $0x10] ss:$8 sps:$4 sm:$0xff]   ;;  %v1436_v10 = vld [vmem:[#allocation6 + $0x20] ss:$8 sps:$4 sm:$0xff]  }
  0x2a   :  { %305 = vmatprep.subr.bf16.mxu1 %v1420_v6  ;;  %477 = vmatprep.subr.bf16.mxu0 %v1416_v4  ;;  %v1438_v11 = vld [vmem:[#allocation6 + $0x34] ss:$8 sps:$4 sm:$0xff]   ;;  %v1448_v12 = vld [vmem:[#allocation6 + $0x30] ss:$8 sps:$4 sm:$0xff]   ;;  %v1153_v13 = vld [vmem:[%s1751_s0 + $0x10] sm:$0xff]   ;;  %v70_v17 = vsub.s32 0, %v69_v16 }
  0x2b   :  { %v1160_v14 = vld [vmem:[%s1751_s0 + $0x18] sm:$0xff]   ;;  %v66_v18 = vld [vmem:[%s1754_s3] sm:$0x3]  ;;  %v74_v19 = vsub.s32 1, %v69_v16  ;;  %v220_v32 = vadd.s32 128, %v219_v28  ;;  %v225_v38 = vand.u32 63, %v219_v28 }
  0x2c   :  { %1074 = vmatmul.mubr.msk.bf16.vlgmr.msra.gmra.mrb[0].mxu0 %vm108_vm0, %v1145_v3  ;;  %v71_v21 = vrot.slane %v66_v18, %v70_v17  ;;  %s1340_s3 = smov 64   ;;  %vm299_vm3 = vcmask 523264   ;;  %v1161_v45 = vld [vmem:[%s1755_s4] sm:$0xff]   ;;  %vm1342_vm4 = vmmov 0   ;;  %s1343_s21 = smov 120   ;;  %vm1040_vm5 = vcmask 64512  }
  0x2d   :  { %163 = vmatprep.mubr.bf16.mxu0 %v1339_v0  ;;  %478 = vmatpush1.bf16.msra.mxu0 %v1418_v5  ;;  %v75_v23 = vrot.slane %v66_v18, %v74_v19  ;;  %v232_v39 = vand.u32 63, %v220_v32  ;;  %vm1492_vm1 = vcmp.lt.s32.totalorder %v225_v38, 32  ;;  %vm1043_vm6 = vcmask 195584  }
  0x2e   :  { %479 = vmatprep.subr.bf16.mxu0 %v1420_v6  ;;  %306 = vmatpush1.bf16.msra.mxu1 %v1426_v7 }
  0x2f   :  { %307 = vmatprep.subr.bf16.mxu1 %v1429_v8  ;;  %vm1498_vm2 = vcmp.lt.s32.totalorder %v232_v39, 32 }
  0x31   :  { %480 = vmatpush1.bf16.msra.mxu0 %v1426_v7 }
  0x32   :  { %481 = vmatprep.subr.bf16.mxu0 %v1429_v8  ;;  %308 = vmatpush1.bf16.msra.mxu1 %v1436_v10 }
  0x33   :  { %309 = vmatprep.subr.bf16.mxu1 %v1438_v11 }
  0x34   :  { %1075 = vmatmul.mubr.msk.bf16.gmra.mrb[4].mxu0 %vm108_vm0, %v1146_v9 }
  0x35   :  { %173 = vmatprep.mubr.bf16.mxu0 %v1339_v0  ;;  %482 = vmatpush1.bf16.msra.mxu0 %v1436_v10 }
  0x36   :  { %483 = vmatprep.subr.bf16.mxu0 %v1438_v11  ;;  %310 = vmatpush1.bf16.msra.mxu1 %v1448_v12 }
  0x37   :  { %390 = vmatprep.subr.bf16.mxu1 %v1416_v4 }
  0x39   :  { %484 = vmatpush1.bf16.msra.mxu0 %v1448_v12  ;;  %336 = vmatmul.mubr.bf16.vlgmr.msra.gmra.mrb[0].mxu1 %v1339_v0 }
  0x3a   :  { %391 = vmatpush1.bf16.msra.mxu1 %v1418_v5  ;;  %422 = vmatprep.mubr.bf16.mxu1 %v1339_v0 }
  0x3b   :  { %392 = vmatprep.subr.bf16.mxu1 %v1420_v6  ;;  %641 = vmatprep.subr.bf16.mxu0 %v1416_v4 }
  0x3c   :  { %1076 = vmatmul.mubr.msk.bf16.gmra.mrb[8].mxu0 %vm108_vm0, %v1153_v13 }
  0x3d   :  { %183 = vmatprep.mubr.bf16.mxu0 %v1339_v0 }
  0x3e   :  { %393 = vmatpush1.bf16.msra.mxu1 %v1426_v7 }
  0x3f   :  { %394 = vmatprep.subr.bf16.mxu1 %v1429_v8 }
  0x42   :  { %395 = vmatpush1.bf16.msra.mxu1 %v1436_v10 }
  0x43   :  { %396 = vmatprep.subr.bf16.mxu1 %v1438_v11 }
  0x44   :  { %1077 = vmatmul.mubr.msk.bf16.gmra.mrb[12].mxu0 %vm108_vm0, %v1160_v14 }
  0x45   :  { %509 = vmatprep.mubr.bf16.mxu0 %v1339_v0 }
  0x46   :  { %397 = vmatpush1.bf16.msra.mxu1 %v1448_v12 }
  0x47   :  { %564 = vmatprep.subr.bf16.mxu1 %v1416_v4 }
  0xff   :  { %v155_v20 = vpop.f32.mrb[0].mxu0 }
 0x100   :  { %v157_v22 = vpop.f32.mrb[1].mxu0  ;;  %v1544_v9 = vadd.f32 %v155_v20, %v71_v21 }
 0x101   :  { %v159_v24 = vpop.f32.mrb[2].mxu0  ;;  %v1556_v17 = vadd.f32 %v157_v22, %v75_v23 }
 0x102   :  { %v1480_v25 = vadd.f32 %v159_v24, %v71_v21  ;;  %v161_v26 = vpop.f32.mrb[3].mxu0 }
 0x103   :  { %v1482_v27 = vadd.f32 %v161_v26, %v75_v23 }
 0x107   :  { %v165_v29 = vpop.f32.mrb[4].mxu0 }
 0x108   :  { %v1484_v30 = vadd.f32 %v165_v29, %v71_v21  ;;  %v167_v31 = vpop.f32.mrb[5].mxu0 }
 0x109   :  { %v1486_v33 = vadd.f32 %v167_v31, %v75_v23  ;;  %v169_v34 = vpop.f32.mrb[6].mxu0 }
 0x10a   :  { %v1488_v35 = vadd.f32 %v169_v34, %v71_v21  ;;  %v171_v36 = vpop.f32.mrb[7].mxu0 }
 0x10b   :  { %v1490_v37 = vadd.f32 %v171_v36, %v75_v23 }
 0x10c   :  { %v337_v42 = vpop.f32.mrb[0].mxu1 }
 0x10d   :  { %v339_v46 = vpop.f32.mrb[1].mxu1 }
 0x10e   :  { %v341_v49 = vpop.f32.mrb[2].mxu1 }
 0x10f   :  { %v175_v40 = vpop.f32.mrb[8].mxu0  ;;  %v342_v52 = vpop.f32.mrb[3].mxu1 }
 0x110   :  { %v1496_v43 = vadd.f32 %v175_v40, %v71_v21  ;;  %v177_v44 = vpop.f32.mrb[9].mxu0 }
 0x111   :  { %v1502_v47 = vadd.f32 %v177_v44, %v75_v23  ;;  %v179_v48 = vpop.f32.mrb[10].mxu0 }
 0x112   :  { %v1504_v50 = vadd.f32 %v179_v48, %v71_v21  ;;  %v181_v51 = vpop.f32.mrb[11].mxu0  ;;  %v558_v53 = vsel %vm1492_vm1, %v1488_v35, %v1496_v43  ;;  %v635_v54 = vsel %vm1492_vm1, %v1496_v43, %v1488_v35 }
 0x113   :  { %v1514_v55 = vadd.f32 %v181_v51, %v75_v23  ;;  %v559_v56 = vsel %vm1498_vm2, %v1490_v37, %v1502_v47  ;;  %v636_v57 = vsel %vm1498_vm2, %v1502_v47, %v1490_v37 }
 0x114   :  { %v471_v58 = vsel %vm1492_vm1, %v1484_v30, %v1504_v50  ;;  %v712_v59 = vsel %vm1492_vm1, %v1504_v50, %v1484_v30 }
 0x115   :  { %v472_v60 = vsel %vm1498_vm2, %v1486_v33, %v1514_v55  ;;  %v713_v61 = vsel %vm1498_vm2, %v1514_v55, %v1486_v33 }
 0x117   :  { %v185_v62 = vpop.f32.mrb[12].mxu0 }
 0x118   :  { %v1540_v63 = vadd.f32 %v185_v62, %v71_v21  ;;  %v187_v1 = vpop.f32.mrb[13].mxu0 }
 0x119   :  { %v1542_v2 = vadd.f32 %v187_v1, %v75_v23  ;;  %v189_v3 = vpop.f32.mrb[14].mxu0 }
 0x11a   :  { %v1546_v13 = vadd.f32 %v189_v3, %v71_v21  ;;  %v191_v14 = vpop.f32.mrb[15].mxu0  ;;  %v384_v15 = vsel %vm1492_vm1, %v1480_v25, %v1540_v63  ;;  %v789_v16 = vsel %vm1492_vm1, %v1540_v63, %v1480_v25 }
 0x11b   :  { %v1558_v18 = vadd.f32 %v191_v14, %v75_v23  ;;  %v385_v19 = vsel %vm1498_vm2, %v1482_v27, %v1542_v2  ;;  %v790_v20 = vsel %vm1498_vm2, %v1542_v2, %v1482_v27 }
 0x11c   :  { %v257_v21 = vsel %vm1492_vm1, %v1544_v9, %v1546_v13  ;;  %v866_v22 = vsel %vm1492_vm1, %v1546_v13, %v1544_v9 }
 0x11d   :  { %v338_v23 = vadd.f32 %v337_v42, %v257_v21  ;;  %v258_v24 = vsel %vm1498_vm2, %v1556_v17, %v1558_v18  ;;  %v867_v26 = vsel %vm1498_vm2, %v1558_v18, %v1556_v17  ;;  %v1341_v17 = vmov 0.0   ;;  %v1162_v18 = vld [vmem:[%s1755_s4 + $0x8] sm:$0xff]  }
 0x11e   :  { %v340_v28 = vadd.f32 %v339_v46, %v258_v24 }
 0x11f   :  { %v1086_v31 = vmul.f32 -1.442695, %v338_v23 }
 0x120   :  { %1165 = vtanh.f32 %v340_v28  ;;  %v1087_v48 = vmul.f32 -1.442695, %v340_v28 }
 0x121   :  { %1167 = vpow2.f32 %v1086_v31 }
 0x12a   :  { %v1166_v29 = vpop.eup %1165 }
 0x12b   :  { %359 = vrot.lane.b32.xlu0 %v1166_v29, %s1340_s3  ;;  %v1168_v32 = vpop.eup %1167 }
 0x12c   :  { %v350_v34 = vadd.f32 1.0, %v1168_v32 }
 0x12e   :  { %1169 = vrcp.f32 %v350_v34 }
 0x138   :  { %v1170_v36 = vpop.eup %1169 }
 0x139   :  { %v357_v40 = vmul.f32 0.0, %v1170_v36 }
 0x19d   :  { %v360_v38 = vpop.permute.xlu0 %359 }
 0x19e   :  { %v362_v39 = vmul.f32 %v1170_v36, %v360_v38 }
 0x1a0   :  { %364 = vrot.lane.b32.xlu0 %v362_v39, %s1340_s3 }
 0x212   :  { %v365_v42 = vpop.permute.xlu0 %364 }
 0x213   :  { %v367_v44 = vadd.f32 %v365_v42, %v357_v40 }
 0x215   :  { %1171 = vtanh.f32 %v367_v44 }
 0x216   :  { %1173 = vpow2.f32 %v1087_v48 }
 0x21f   :  { %v1172_v46 = vpop.eup %1171 }
 0x220   :  { %370 = vrot.lane.b32.xlu1 %v1172_v46, %s1340_s3  ;;  %v1174_v49 = vpop.eup %1173 }
 0x221   :  { %v351_v51 = vadd.f32 1.0, %v1174_v49 }
 0x223   :  { %1175 = vrcp.f32 %v351_v51 }
 0x22d   :  { %v1176_v52 = vpop.eup %1175 }
 0x292   :  { %v371_v62 = vpop.permute.xlu1 %370 }
 0x293   :  { %v373_v1 = vmul.f32 %v1176_v52, %v371_v62 }
 0x295   :  { %v386_v3 = vpack.c.bf16 %v373_v1, %v373_v1 }
 0x297   :  { %1088 = vmatmul.mubr.msk.bf16.vlgmr.msra.gmra.mrb[4].mxu1 %vm299_vm3, %v386_v3 }
 0x298   :  { %565 = vmatpush1.bf16.msra.mxu1 %v1418_v5  ;;  %596 = vmatprep.mubr.bf16.mxu1 %v1339_v0 }
 0x299   :  { %566 = vmatprep.subr.bf16.mxu1 %v1420_v6 }
 0x29c   :  { %567 = vmatpush1.bf16.msra.mxu1 %v1426_v7 }
 0x29d   :  { %568 = vmatprep.subr.bf16.mxu1 %v1429_v8 }
 0x2a0   :  { %569 = vmatpush1.bf16.msra.mxu1 %v1436_v10 }
 0x2a1   :  { %570 = vmatprep.subr.bf16.mxu1 %v1438_v11 }
 0x2a4   :  { %571 = vmatpush1.bf16.msra.mxu1 %v1448_v12 }
 0x2a5   :  { %718 = vmatprep.subr.bf16.mxu1 %v1416_v4 }
 0x36a   :  { %v424_v14 = vpop.f32.mrb[4].mxu1 }
 0x36b   :  { %v425_v21 = vadd.f32 %v424_v14, %v384_v15  ;;  %v426_v23 = vpop.f32.mrb[5].mxu1 }
 0x36c   :  { %v427_v24 = vadd.f32 %v426_v23, %v385_v19  ;;  %v428_v28 = vpop.f32.mrb[6].mxu1 }
 0x36d   :  { %v429_v29 = vpop.f32.mrb[7].mxu1  ;;  %v1089_v32 = vmul.f32 -1.442695, %v425_v21 }
 0x36e   :  { %1177 = vtanh.f32 %v427_v24  ;;  %v1090_v48 = vmul.f32 -1.442695, %v427_v24 }
 0x36f   :  { %1179 = vpow2.f32 %v1089_v32 }
 0x378   :  { %v1178_v31 = vpop.eup %1177 }
 0x379   :  { %446 = vrot.lane.b32.xlu1 %v1178_v31, %s1340_s3  ;;  %v1180_v34 = vpop.eup %1179 }
 0x37a   :  { %v437_v36 = vadd.f32 1.0, %v1180_v34 }
 0x37c   :  { %1181 = vrcp.f32 %v437_v36 }
 0x386   :  { %v1182_v38 = vpop.eup %1181 }
 0x387   :  { %v444_v42 = vmul.f32 %v1182_v38, %v367_v44 }
 0x3eb   :  { %v447_v39 = vpop.permute.xlu1 %446 }
 0x3ec   :  { %v449_v40 = vmul.f32 %v1182_v38, %v447_v39 }
 0x3ee   :  { %451 = vrot.lane.b32.xlu0 %v449_v40, %s1340_s3 }
 0x460   :  { %v452_v15 = vpop.permute.xlu0 %451 }
 0x461   :  { %v454_v46 = vadd.f32 %v452_v15, %v444_v42 }
 0x463   :  { %1183 = vtanh.f32 %v454_v46 }
 0x464   :  { %1185 = vpow2.f32 %v1090_v48 }
 0x46d   :  { %v1184_v19 = vpop.eup %1183 }
 0x46e   :  { %457 = vrot.lane.b32.xlu1 %v1184_v19, %s1340_s3  ;;  %v1186_v49 = vpop.eup %1185 }
 0x46f   :  { %v438_v51 = vadd.f32 1.0, %v1186_v49 }
 0x471   :  { %1187 = vrcp.f32 %v438_v51 }
 0x47b   :  { %v1188_v52 = vpop.eup %1187 }
 0x4e0   :  { %v458_v62 = vpop.permute.xlu1 %457 }
 0x4e1   :  { %v460_v1 = vmul.f32 %v1188_v52, %v458_v62 }
 0x4e3   :  { %v473_v3 = vpack.c.bf16 %v460_v1, %v460_v1 }
 0x4e5   :  { %1091 = vmatmul.mubr.msk.bf16.vlgmr.msra.gmra.mrb[16].mxu0 %vm299_vm3, %v473_v3 }
 0x4e6   :  { %642 = vmatpush1.bf16.msra.mxu0 %v1418_v5  ;;  %673 = vmatprep.mubr.bf16.mxu0 %v1339_v0 }
 0x4e7   :  { %643 = vmatprep.subr.bf16.mxu0 %v1420_v6 }
 0x4ea   :  { %644 = vmatpush1.bf16.msra.mxu0 %v1426_v7 }
 0x4eb   :  { %645 = vmatprep.subr.bf16.mxu0 %v1429_v8 }
 0x4ee   :  { %646 = vmatpush1.bf16.msra.mxu0 %v1436_v10 }
 0x4ef   :  { %647 = vmatprep.subr.bf16.mxu0 %v1438_v11 }
 0x4f2   :  { %648 = vmatpush1.bf16.msra.mxu0 %v1448_v12 }
 0x4f3   :  { %795 = vmatprep.subr.bf16.mxu0 %v1416_v4 }
 0x5b8   :  { %v511_v44 = vpop.f32.mrb[16].mxu0 }
 0x5b9   :  { %v512_v14 = vadd.f32 %v511_v44, %v471_v58  ;;  %v513_v21 = vpop.f32.mrb[17].mxu0 }
 0x5ba   :  { %v514_v23 = vadd.f32 %v513_v21, %v472_v60  ;;  %v515_v24 = vpop.f32.mrb[18].mxu0 }
 0x5bb   :  { %v516_v28 = vpop.f32.mrb[19].mxu0  ;;  %v1092_v31 = vmul.f32 -1.442695, %v512_v14 }
 0x5bc   :  { %1189 = vtanh.f32 %v514_v23  ;;  %v1093_v15 = vmul.f32 -1.442695, %v514_v23 }
 0x5bd   :  { %1191 = vpow2.f32 %v1092_v31 }
 0x5c6   :  { %v1190_v29 = vpop.eup %1189 }
 0x5c7   :  { %533 = vrot.lane.b32.xlu0 %v1190_v29, %s1340_s3  ;;  %v1192_v32 = vpop.eup %1191 }
 0x5c8   :  { %v524_v34 = vadd.f32 1.0, %v1192_v32 }
 0x5ca   :  { %1193 = vrcp.f32 %v524_v34 }
 0x5d4   :  { %v1194_v36 = vpop.eup %1193 }
 0x5d5   :  { %v531_v39 = vmul.f32 %v1194_v36, %v454_v46 }
 0x639   :  { %v534_v58 = vpop.permute.xlu0 %533 }
 0x63a   :  { %v536_v38 = vmul.f32 %v1194_v36, %v534_v58 }
 0x63c   :  { %538 = vrot.lane.b32.xlu1 %v536_v38, %s1340_s3 }
 0x6ae   :  { %v539_v40 = vpop.permute.xlu1 %538 }
 0x6af   :  { %v541_v42 = vadd.f32 %v539_v40, %v531_v39 }
 0x6b1   :  { %1195 = vtanh.f32 %v541_v42 }
 0x6b2   :  { %1197 = vpow2.f32 %v1093_v15 }
 0x6bb   :  { %v1196_v60 = vpop.eup %1195 }
 0x6bc   :  { %544 = vrot.lane.b32.xlu0 %v1196_v60, %s1340_s3  ;;  %v1198_v19 = vpop.eup %1197 }
 0x6bd   :  { %v525_v48 = vadd.f32 1.0, %v1198_v19 }
 0x6bf   :  { %1199 = vrcp.f32 %v525_v48 }
 0x6c9   :  { %v1200_v49 = vpop.eup %1199 }
 0x72e   :  { %v545_v51 = vpop.permute.xlu0 %544 }
 0x72f   :  { %v547_v52 = vmul.f32 %v1200_v49, %v545_v51 }
 0x731   :  { %v560_v62 = vpack.c.bf16 %v547_v52, %v547_v52 }
 0x733   :  { %1094 = vmatmul.mubr.msk.bf16.vlgmr.msra.gmra.mrb[8].mxu1 %vm299_vm3, %v560_v62 }
 0x734   :  { %719 = vmatpush1.bf16.msra.mxu1 %v1418_v5  ;;  %750 = vmatprep.mubr.bf16.mxu1 %v1339_v0 }
 0x735   :  { %720 = vmatprep.subr.bf16.mxu1 %v1420_v6 }
 0x738   :  { %721 = vmatpush1.bf16.msra.mxu1 %v1426_v7 }
 0x739   :  { %722 = vmatprep.subr.bf16.mxu1 %v1429_v8 }
 0x73c   :  { %723 = vmatpush1.bf16.msra.mxu1 %v1436_v10 }
 0x73d   :  { %724 = vmatprep.subr.bf16.mxu1 %v1438_v11 }
 0x740   :  { %725 = vmatpush1.bf16.msra.mxu1 %v1448_v12 }
 0x741   :  { %872 = vmatprep.subr.bf16.mxu1 %v1416_v4 }
 0x806   :  { %v598_v46 = vpop.f32.mrb[8].mxu1 }
 0x807   :  { %v599_v1 = vadd.f32 %v598_v46, %v558_v53  ;;  %v600_v3 = vpop.f32.mrb[9].mxu1 }
 0x808   :  { %v601_v44 = vadd.f32 %v600_v3, %v559_v56  ;;  %v602_v14 = vpop.f32.mrb[10].mxu1 }
 0x809   :  { %v603_v21 = vpop.f32.mrb[11].mxu1  ;;  %v1095_v4 = vmul.f32 -1.442695, %v599_v1 }
 0x80a   :  { %1201 = vtanh.f32 %v601_v44  ;;  %v1096_v58 = vmul.f32 -1.442695, %v601_v44 }
 0x80b   :  { %1203 = vpow2.f32 %v1095_v4 }
 0x814   :  { %v1202_v23 = vpop.eup %1201 }
 0x815   :  { %620 = vrot.lane.b32.xlu1 %v1202_v23, %s1340_s3  ;;  %v1204_v24 = vpop.eup %1203 }
 0x816   :  { %v611_v28 = vadd.f32 1.0, %v1204_v24 }
 0x818   :  { %1205 = vrcp.f32 %v611_v28 }
 0x822   :  { %v1206_v29 = vpop.eup %1205 }
 0x823   :  { %v618_v32 = vmul.f32 %v1206_v29, %v541_v42 }
 0x887   :  { %v621_v53 = vpop.permute.xlu1 %620 }
 0x888   :  { %v623_v31 = vmul.f32 %v1206_v29, %v621_v53 }
 0x88a   :  { %625 = vrot.lane.b32.xlu0 %v623_v31, %s1340_s3 }
 0x8fc   :  { %v626_v34 = vpop.permute.xlu0 %625 }
 0x8fd   :  { %v628_v36 = vadd.f32 %v626_v34, %v618_v32 }
 0x8ff   :  { %1207 = vtanh.f32 %v628_v36 }
 0x900   :  { %1209 = vpow2.f32 %v1096_v58 }
 0x909   :  { %v1208_v56 = vpop.eup %1207 }
 0x90a   :  { %631 = vrot.lane.b32.xlu1 %v1208_v56, %s1340_s3  ;;  %v1210_v38 = vpop.eup %1209 }
 0x90b   :  { %v612_v39 = vadd.f32 1.0, %v1210_v38 }
 0x90d   :  { %1211 = vrcp.f32 %v612_v39 }
 0x917   :  { %v1212_v40 = vpop.eup %1211 }
 0x97c   :  { %v632_v60 = vpop.permute.xlu1 %631 }
 0x97d   :  { %v634_v15 = vmul.f32 %v1212_v40, %v632_v60 }
 0x97f   :  { %v637_v19 = vpack.c.bf16 %v634_v15, %v634_v15 }
 0x981   :  { %1097 = vmatmul.mubr.msk.bf16.vlgmr.msra.gmra.mrb[20].mxu0 %vm299_vm3, %v637_v19 }
 0x982   :  { %796 = vmatpush1.bf16.msra.mxu0 %v1418_v5  ;;  %827 = vmatprep.mubr.bf16.mxu0 %v1339_v0 }
 0x983   :  { %797 = vmatprep.subr.bf16.mxu0 %v1420_v6 }
 0x986   :  { %798 = vmatpush1.bf16.msra.mxu0 %v1426_v7 }
 0x987   :  { %799 = vmatprep.subr.bf16.mxu0 %v1429_v8 }
 0x98a   :  { %800 = vmatpush1.bf16.msra.mxu0 %v1436_v10 }
 0x98b   :  { %801 = vmatprep.subr.bf16.mxu0 %v1438_v11 }
 0x98e   :  { %802 = vmatpush1.bf16.msra.mxu0 %v1448_v12 }
 0x98f   :  { %1120 = vmatprep.subr.bf16.mxu0 %v1341_v17 }
 0xa54   :  { %v675_v42 = vpop.f32.mrb[20].mxu0 }
 0xa55   :  { %v676_v48 = vadd.f32 %v675_v42, %v635_v54  ;;  %v677_v49 = vpop.f32.mrb[21].mxu0 }
 0xa56   :  { %v678_v51 = vadd.f32 %v677_v49, %v636_v57  ;;  %v679_v52 = vpop.f32.mrb[22].mxu0 }
 0xa57   :  { %v680_v62 = vpop.f32.mrb[23].mxu0  ;;  %v1098_v1 = vmul.f32 -1.442695, %v676_v48 }
 0xa58   :  { %1213 = vtanh.f32 %v678_v51  ;;  %v1099_v57 = vmul.f32 -1.442695, %v678_v51 }
 0xa59   :  { %1215 = vpow2.f32 %v1098_v1 }
 0xa62   :  { %v1214_v46 = vpop.eup %1213 }
 0xa63   :  { %697 = vrot.lane.b32.xlu0 %v1214_v46, %s1340_s3  ;;  %v1216_v3 = vpop.eup %1215 }
 0xa64   :  { %v688_v44 = vadd.f32 1.0, %v1216_v3 }
 0xa66   :  { %1217 = vrcp.f32 %v688_v44 }
 0xa70   :  { %v1218_v35 = vpop.eup %1217 }
 0xa71   :  { %v695_v14 = vmul.f32 %v1218_v35, %v628_v36 }
 0xad5   :  { %v698_v43 = vpop.permute.xlu0 %697 }
 0xad6   :  { %v700_v54 = vmul.f32 %v1218_v35, %v698_v43 }
 0xad8   :  { %702 = vrot.lane.b32.xlu1 %v700_v54, %s1340_s3 }
 0xb4a   :  { %v703_v21 = vpop.permute.xlu1 %702 }
 0xb4b   :  { %v705_v37 = vadd.f32 %v703_v21, %v695_v14 }
 0xb4d   :  { %1219 = vtanh.f32 %v705_v37 }
 0xb4e   :  { %1221 = vpow2.f32 %v1099_v57 }
 0xb57   :  { %v1220_v47 = vpop.eup %1219 }
 0xb58   :  { %708 = vrot.lane.b32.xlu0 %v1220_v47, %s1340_s3  ;;  %v1222_v23 = vpop.eup %1221 }
 0xb59   :  { %v689_v4 = vadd.f32 1.0, %v1222_v23 }
 0xb5b   :  { %1223 = vrcp.f32 %v689_v4 }
 0xb65   :  { %v1224_v24 = vpop.eup %1223 }
 0xbca   :  { %v709_v28 = vpop.permute.xlu0 %708 }
 0xbcb   :  { %v711_v29 = vmul.f32 %v1224_v24, %v709_v28 }
 0xbcd   :  { %v714_v53 = vpack.c.bf16 %v711_v29, %v711_v29 }
 0xbcf   :  { %1100 = vmatmul.mubr.msk.bf16.vlgmr.msra.gmra.mrb[12].mxu1 %vm299_vm3, %v714_v53 }
 0xbd0   :  { %873 = vmatpush1.bf16.msra.mxu1 %v1418_v5  ;;  %904 = vmatprep.mubr.bf16.mxu1 %v1339_v0 }
 0xbd1   :  { %874 = vmatprep.subr.bf16.mxu1 %v1420_v6 }
 0xbd4   :  { %875 = vmatpush1.bf16.msra.mxu1 %v1426_v7 }
 0xbd5   :  { %876 = vmatprep.subr.bf16.mxu1 %v1429_v8 }
 0xbd8   :  { %877 = vmatpush1.bf16.msra.mxu1 %v1436_v10 }
 0xbd9   :  { %878 = vmatprep.subr.bf16.mxu1 %v1438_v11 }
 0xbdc   :  { %879 = vmatpush1.bf16.msra.mxu1 %v1448_v12 }
 0xca2   :  { %v752_v31 = vpop.f32.mrb[12].mxu1 }
 0xca3   :  { %v753_v5 = vadd.f32 %v752_v31, %v712_v59  ;;  %v754_v0 = vpop.f32.mrb[13].mxu1 }
 0xca4   :  { %v755_v6 = vadd.f32 %v754_v0, %v713_v61  ;;  %v756_v7 = vpop.f32.mrb[14].mxu1 }
 0xca5   :  { %v757_v8 = vpop.f32.mrb[15].mxu1  ;;  %v1101_v11 = vmul.f32 -1.442695, %v753_v5 }
 0xca6   :  { %1225 = vtanh.f32 %v755_v6  ;;  %v1102_v61 = vmul.f32 -1.442695, %v755_v6  ;;  %v1164_v6 = vld [vmem:[%s1755_s4 + $0x18] sm:$0xff]  }
 0xca7   :  { %1227 = vpow2.f32 %v1101_v11 }
 0xcb0   :  { %v1226_v10 = vpop.eup %1225 }
 0xcb1   :  { %774 = vrot.lane.b32.xlu1 %v1226_v10, %s1340_s3  ;;  %v1228_v12 = vpop.eup %1227 }
 0xcb2   :  { %v765_v32 = vadd.f32 1.0, %v1228_v12 }
 0xcb4   :  { %1229 = vrcp.f32 %v765_v32 }
 0xcbe   :  { %v1230_v30 = vpop.eup %1229 }
 0xcbf   :  { %v772_v34 = vmul.f32 %v1230_v30, %v705_v37 }
 0xd23   :  { %v775_v50 = vpop.permute.xlu1 %774 }
 0xd24   :  { %v777_v59 = vmul.f32 %v1230_v30, %v775_v50 }
 0xd26   :  { %779 = vrot.lane.b32.xlu0 %v777_v59, %s1340_s3 }
 0xd98   :  { %v780_v36 = vpop.permute.xlu0 %779 }
 0xd99   :  { %v782_v33 = vadd.f32 %v780_v36, %v772_v34  ;;  %v1109_v34 = vld [vmem:[%s1756_s5] ss:$0 sm:$0xff]  ;;  %s1344_s5 = smov [#allocation8]  }
 0xd9a   :  { %s1051_s24 = sshll.u32 %s1344_s5, 4  ;;  %s1052_s24 = int_to_ptr.vmem [resolvable:$true] %s1051_s24 }
 0xd9b   :  { %1231 = vtanh.f32 %v782_v33  ;;  %p1312_p3 = scmp.lt.s32.totalorder %s1052_s24, %s1052_s24 }
 0xd9c   :  { %1233 = vpow2.f32 %v1102_v61 }
 0xda5   :  { %v1232_v55 = vpop.eup %1231 }
 0xda6   :  { %785 = vrot.lane.b32.xlu1 %v1232_v55, %s1340_s3  ;;  %v1234_v56 = vpop.eup %1233 }
 0xda7   :  { %v766_v58 = vadd.f32 1.0, %v1234_v56 }
 0xda9   :  { %1235 = vrcp.f32 %v766_v58 }
 0xdb3   :  { %v1236_v38 = vpop.eup %1235 }
 0xe18   :  { %v786_v39 = vpop.permute.xlu1 %785 }
 0xe19   :  { %v788_v40 = vmul.f32 %v1236_v38, %v786_v39 }
 0xe1b   :  { %v791_v60 = vpack.c.bf16 %v788_v40, %v788_v40  ;;  %v1026_v40 = vld [vmem:[%s1757_s6] sm:$0xff] }
 0xe1d   :  { %1103 = vmatmul.mubr.msk.bf16.vlgmr.msra.gmra.mrb[24].mxu0 %vm299_vm3, %v791_v60 }
 0xe1e   :  { %1121 = vmatpush3.bf16.msra.mxu0 %v1161_v45  ;;  %1128 = vmatprep.mubr.msk.bf16.mxu0 %vm1342_vm4, %v1341_v17 }
 0xe1f   :  { %1122 = vmatprep.subr.bf16.mxu0 %v1341_v17 }
 0xe22   :  { %1123 = vmatpush3.bf16.msra.mxu0 %v1162_v18 }
 0xe23   :  { %1124 = vmatprep.subr.bf16.mxu0 %v1341_v17 }
 0xef0   :  { %v829_v15 = vpop.f32.mrb[24].mxu0 }
 0xef1   :  { %v830_v19 = vadd.f32 %v829_v15, %v789_v16  ;;  %v831_v42 = vpop.f32.mrb[25].mxu0 }
 0xef2   :  { %v832_v48 = vadd.f32 %v831_v42, %v790_v20  ;;  %v833_v49 = vpop.f32.mrb[26].mxu0 }
 0xef3   :  { %v834_v51 = vpop.f32.mrb[27].mxu0  ;;  %v1104_v62 = vmul.f32 -1.442695, %v830_v19 }
 0xef4   :  { %1237 = vtanh.f32 %v832_v48  ;;  %v1105_v20 = vmul.f32 -1.442695, %v832_v48 }
 0xef5   :  { %1239 = vpow2.f32 %v1104_v62 }
 0xefe   :  { %v1238_v52 = vpop.eup %1237 }
 0xeff   :  { %851 = vrot.lane.b32.xlu0 %v1238_v52, %s1340_s3  ;;  %v1240_v46 = vpop.eup %1239 }
 0xf00   :  { %v842_v1 = vadd.f32 1.0, %v1240_v46 }
 0xf02   :  { %1241 = vrcp.f32 %v842_v1 }
 0xf0c   :  { %v1242_v25 = vpop.eup %1241 }
 0xf0d   :  { %v849_v3 = vmul.f32 %v1242_v25, %v782_v33 }
 0xf71   :  { %v852_v63 = vpop.permute.xlu0 %851 }
 0xf72   :  { %v854_v16 = vmul.f32 %v1242_v25, %v852_v63 }
 0xf74   :  { %856 = vrot.lane.b32.xlu1 %v854_v16, %s1340_s3 }
 0xfe6   :  { %v857_v44 = vpop.permute.xlu1 %856 }
 0xfe7   :  { %v859_v27 = vadd.f32 %v857_v44, %v849_v3 }
 0xfe9   :  { %1243 = vtanh.f32 %v859_v27 }
 0xfea   :  { %1245 = vpow2.f32 %v1105_v20 }
 0xff3   :  { %v1244_v2 = vpop.eup %1243 }
 0xff4   :  { %862 = vrot.lane.b32.xlu0 %v1244_v2, %s1340_s3  ;;  %v1246_v35 = vpop.eup %1245 }
 0xff5   :  { %v843_v43 = vadd.f32 1.0, %v1246_v35 }
 0xff7   :  { %1247 = vrcp.f32 %v843_v43 }
0x1001   :  { %v1248_v54 = vpop.eup %1247 }
0x1066   :  { %v863_v14 = vpop.permute.xlu0 %862 }
0x1067   :  { %v865_v21 = vmul.f32 %v1248_v54, %v863_v14 }
0x1069   :  { %v868_v37 = vpack.c.bf16 %v865_v21, %v865_v21 }
0x106b   :  { %1106 = vmatmul.mubr.msk.bf16.vlgmr.msra.gmra.mrb[16].mxu1 %vm299_vm3, %v868_v37 }
0x113e   :  { %v906_v47 = vpop.f32.mrb[16].mxu1 }
0x113f   :  { %v907_v57 = vadd.f32 %v906_v47, %v866_v22  ;;  %v908_v23 = vpop.f32.mrb[17].mxu1 }
0x1140   :  { %v909_v4 = vadd.f32 %v908_v23, %v867_v26  ;;  %v910_v24 = vpop.f32.mrb[18].mxu1  ;;  %v1163_v26 = vld [vmem:[%s1755_s4 + $0x10] sm:$0xff]  }
0x1141   :  { %v911_v28 = vpop.f32.mrb[19].mxu1  ;;  %v1107_v53 = vmul.f32 -1.442695, %v907_v57  ;;  %1125 = vmatpush3.bf16.msra.mxu0 %v1163_v26 }
0x1142   :  { %1249 = vtanh.f32 %v909_v4  ;;  %1126 = vmatprep.subr.bf16.mxu0 %v1341_v17  ;;  %v1108_v10 = vmul.f32 -1.442695, %v909_v4 }
0x1143   :  { %1251 = vpow2.f32 %v1107_v53 }
0x1145   :  { %1127 = vmatpush3.bf16.msra.mxu0 %v1164_v6 }
0x114c   :  { %v1250_v29 = vpop.eup %1249 }
0x114d   :  { %928 = vrot.lane.b32.xlu1 %v1250_v29, %s1340_s3  ;;  %v1252_v41 = vpop.eup %1251 }
0x114e   :  { %v919_v31 = vadd.f32 1.0, %v1252_v41 }
0x1150   :  { %1253 = vrcp.f32 %v919_v31 }
0x115a   :  { %v1254_v9 = vpop.eup %1253 }
0x115b   :  { %v926_v5 = vmul.f32 %v1254_v9, %v859_v27 }
0x11bf   :  { %v929_v13 = vpop.permute.xlu1 %928 }
0x11c0   :  { %v931_v22 = vmul.f32 %v1254_v9, %v929_v13 }
0x11c2   :  { %933 = vrot.lane.b32.xlu0 %v931_v22, %s1340_s3 }
0x1234   :  { %v934_v0 = vpop.permute.xlu0 %933 }
0x1235   :  { %v936_v7 = vadd.f32 %v934_v0, %v926_v5 }
0x1237   :  { %1255 = vtanh.f32 %v936_v7 }
0x1238   :  { %1257 = vpow2.f32 %v1108_v10 }
0x1241   :  { %v1256_v8 = vpop.eup %1255 }
0x1242   :  { %939 = vrot.lane.b32.xlu1 %v1256_v8, %s1340_s3  ;;  %v1258_v11 = vpop.eup %1257 }
0x1243   :  { %v920_v12 = vadd.f32 1.0, %v1258_v11 }
0x1245   :  { %1259 = vrcp.f32 %v920_v12 }
0x124f   :  { %v1260_v32 = vpop.eup %1259 }
0x12b4   :  { %v940_v30 = vpop.permute.xlu1 %939 }
0x12b5   :  { %v942_v50 = vmul.f32 %v1260_v32, %v940_v30 }
0x12b7   :  { %v943_v59 = vpack.c.bf16 %v942_v50, %v942_v50 }
0x12b9   :  { %1129 = vmatmul.mubr.msk.bf16.vlgmr.msra.gmra.mrb[28].mxu0 %vm299_vm3, %v943_v59 }
0x138c   :  { %v1020_v36 = vpop.f32.mrb[28].mxu0 }
0x138d   :  { %v1021_v33 = vadd.f32 %v1109_v34, %v1020_v36  ;;  %v1130_v55 = vpop.f32.mrb[29].mxu0 }
0x138e   :  { %v1023_v61 = vpop.f32.mrb[30].mxu0 }
0x138f   :  { %v1027_v56 = vmul.f32 0.5, %v1021_v33  ;;  %1037 = vrot.lane.b32.xlu1 %v1021_v33, %s1337_s12  ;;  %v1131_v58 = vpop.f32.mrb[31].mxu0  ;;  %s1307_s12 = scalar_lea.vmem %s1052_s24, 128 }
0x1390   :  { %p1308_p2 = scmp.ne.s32.totalorder %s1052_s24, %s1307_s12  ;;  %p1313_p4 = scmp.lt.s32.totalorder %s1307_s12, %s1307_s12 }
0x1391   :  { %v1028_v38 = vmul.f32 1.442695, %v1027_v56 }
0x1392   :  { %p1314_p5 = por %p1313_p4, %p1312_p3 }
0x1393   :  { %1261 = vpow2.f32 %v1028_v38 }
0x1394   :  { %p1315_p6 = pnand %p1314_p5, %p1308_p2 }
0x139d   :  { %v1262_v39 = vpop.eup %1261 }
0x139e   :  { %1031 = vrot.lane.b32.xlu0 %v1262_v39, %s1343_s21 }
0x1401   :  { %v1038_v42 = vpop.permute.xlu1 %1037 }
0x1410   :  { %v1032_v60 = vpop.permute.xlu0 %1031 }
0x1411   :  { %v1034_v15 = vmul.f32 %v1032_v60, %v1026_v40 }
0x1413   :  { %v1035_v19 = vadd.f32 %v1034_v15, %v1021_v33 }
0x1415   :  { %v1041_v48 = vsel %vm1040_vm5, %v1035_v19, %v1038_v42 }
0x1416   :  { %v1042_v49 = vsel %vm108_vm0, %v1041_v48, %v1038_v42 }
0x1417   :  { %1044 = vst.msk [vmem:[#allocation8] sm:$0xff] %vm1043_vm6, %v1042_v49 }
0x1418   :  { %1318 = shalt.err (!%p1315_p6)
}
0x1419   :  { %s1319_s25 = scalar_lea.hbm %s1758_s7, 128 }
0x141a   :  { %p1320_p7 = scmp.ne.s32.totalorder %s1758_s7, %s1319_s25  ;;  %p1323_p8 = scmp.lt.u32.totalorder %s1319_s25, %s1758_s7 }
0x141c   :  { %p1325_p9 = pnand %p1323_p8, %p1320_p7 }
0x141e   :  { %1328 = shalt.err (!%p1325_p9)
}
0x141f   :  { %1054 = dma.vmem_to_hbm [thread:$0]  %s1052_s24, 128, %s1758_s7, [#allocation5]  }
0x1420   :  { %1333 = dma.done.wait [#allocation5], 128  }
0x1421   :  { %1334 = vsyncadd [#allocation5], 4294967168 }
0x1422   :  { %1058 = vsyncpa [#allocation4], 1 }
0x1423   :  { %1059 = vsyncpa [#allocation7], 1 }
0x1424   :  { %1060 = vsyncpa [#allocation5], 1 }

</bundles_post_ra>
